<compile_context>
chip_gen: v7x
topology: tpu7x:2x2x1
jax: 0.10.0
libtpu: 0.0.40
codegen_flags: <defaults>
</compile_context>

<pallas_src>
import functools

import jax
import jax.numpy as jnp
from jax.experimental import pallas as pl
from jax.experimental.pallas import tpu as pltpu

HID1 = 256                       # first NormedLinear width
HID2 = 512                       # second NormedLinear width (latent dim)
SIMNORM_DIM = 8
NGROUPS = HID2 // SIMNORM_DIM    # 64


# ----------------------------- math helpers -----------------------------

def _mish_fast(x):
    # mish(x) = x * tanh(softplus(x)).  With t = exp(x):
    #   tanh(log1p(t)) = ((1+t)^2 - 1) / ((1+t)^2 + 1) = 1 - 2/((1+t)^2 + 1)
    # -> one EUP exp + one EUP approx reciprocal; no VPU divide, no tanh.
    # Clamp keeps exp finite; for x >= 30 tanh(softplus(x)) == 1 in f32.
    t = jnp.exp(jnp.minimum(x, 30.0))
    u = (1.0 + t) * (1.0 + t)
    return x * (1.0 - 2.0 * pl.reciprocal(u + 1.0, approx=True))


def _mish_ref(x):
    sp = jnp.maximum(x, 0.0) + jnp.log1p(jnp.exp(-jnp.abs(x)))
    return x * jnp.tanh(sp)


def _layernorm_onepass(x, gamma, beta, eps=1e-5):
    # One-pass statistics: two independent reductions (mean, E[x^2]) instead of
    # the dependent (x-mean)^2 second pass -> one fewer (rows, D) VPU sweep and
    # the XLU reductions can issue back-to-back.
    mean = jnp.mean(x, axis=-1, keepdims=True)
    ex2 = jnp.mean(x * x, axis=-1, keepdims=True)
    var = jnp.maximum(ex2 - mean * mean, 0.0)          # cancellation guard
    return (x - mean) * jax.lax.rsqrt(var + eps) * gamma + beta


def _layernorm_ref(x, gamma, beta, eps=1e-5):
    mean = jnp.mean(x, axis=-1, keepdims=True)
    var = jnp.mean((x - mean) ** 2, axis=-1, keepdims=True)
    return (x - mean) * jax.lax.rsqrt(var + eps) * gamma + beta


# ------------------------------- kernel ---------------------------------

def encoder_kernel(x_ref, w1_ref, p1_ref, w2_ref, p2_ref,
                   gdn_ref, gup_ref, o_ref):
    # p*_ref rows: 0 = bias, 1 = LN gamma, 2 = LN beta (rows 3..7 are padding).
    # --- NormedLinear 1: Linear -> LayerNorm -> Mish ---
    x16 = x_ref[...].astype(jnp.bfloat16)
    h = jnp.dot(x16, w1_ref[...], preferred_element_type=jnp.float32)
    h = h + p1_ref[0:1, :]
    h = _layernorm_onepass(h, p1_ref[1:2, :], p1_ref[2:3, :])
    h = _mish_fast(h)

    # --- NormedLinear 2: Linear -> LayerNorm -> SimNorm(8) ---
    h = jnp.dot(h.astype(jnp.bfloat16), w2_ref[...],
                preferred_element_type=jnp.float32)
    h = h + p2_ref[0:1, :]
    h = _layernorm_onepass(h, p2_ref[1:2, :], p2_ref[2:3, :])

    # SimNorm: softmax over contiguous groups of 8 lanes with NO reshape.
    # The per-row max shift is constant within every group, so each group's
    # softmax is unchanged.  The -80 floor guarantees exp > 0 for every lane,
    # so a group sum can never underflow to 0 (reciprocal stays finite) even
    # if |gamma2|/|beta2| grow during training; for the nominal LayerNorm
    # range the floor never activates and the result is exact.
    m = jnp.max(h, axis=-1, keepdims=True)
    e = jnp.exp(jnp.maximum(h - m, -80.0))                          # (tb, 512)
    # Group sum / broadcast via exact 0/1 bf16 matrices (native-rate MXU,
    # f32 accumulation).
    gsum = jnp.dot(e.astype(jnp.bfloat16), gdn_ref[...],
                   preferred_element_type=jnp.float32)              # (tb, 64)
    inv = pl.reciprocal(gsum, approx=True)                          # EUP slot
    denom_inv = jnp.dot(inv.astype(jnp.bfloat16), gup_ref[...],
                        preferred_element_type=jnp.float32)         # (tb, 512)
    o_ref[...] = (e * denom_inv).astype(o_ref.dtype)


# ------------------------------- wrapper --------------------------------

def _pack_aux(b, g, be, d):
    """Pack bias / LN gamma / LN beta into one (8, d) f32 operand (rows 0..2)."""
    p = jnp.zeros((8, d), jnp.float32)
    p = p.at[0].set(b.astype(jnp.float32))
    p = p.at[1].set(g.astype(jnp.float32))
    p = p.at[2].set(be.astype(jnp.float32))
    return p


def prepare_params(params):
    """One-time layout plumbing:
      * weights -> (in_features, out_features), bf16 (MXU operands)
      * (bias, gamma, beta) packed into one (8, D) f32 array per layer
      * exact 0/1 SimNorm group-sum (512,64) / group-broadcast (64,512), bf16
    """
    gidx = jnp.arange(HID2) // SIMNORM_DIM
    gdn = (gidx[:, None] == jnp.arange(NGROUPS)[None, :]).astype(jnp.bfloat16)
    return {
        "w1t": params["w1"].T.astype(jnp.bfloat16),        # (obs_dim, 256)
        "p1": _pack_aux(params["b1"], params["g1"], params["be1"], HID1),
        "w2t": params["w2"].T.astype(jnp.bfloat16),        # (256, 512)
        "p2": _pack_aux(params["b2"], params["g2"], params["be2"], HID2),
        "gdn": gdn,                                        # (512, 64)  bf16
        "gup": gdn.T,                                      # (64, 512)  bf16
    }


@functools.partial(jax.jit, static_argnames=("tile_b", "out_dtype"))
def encoder_forward(obs, prep, tile_b=512, out_dtype=jnp.float32):
    B, obs_dim = obs.shape
    tile_b = min(tile_b, B)
    assert B % tile_b == 0, "batch must be a multiple of tile_b"

    row = lambda i: (i, 0)      # tile over batch only
    full = lambda i: (0, 0)     # loop-invariant params: resident, no re-DMA

    out_bytes = jnp.dtype(out_dtype).itemsize
    flops = 2 * B * (obs_dim * HID1 + HID1 * HID2
                     + HID2 * NGROUPS + NGROUPS * HID2)
    transcendentals = B * (2 * HID1 + HID2 + NGROUPS)   # mish exp+rcp, sn exp+rcp
    bytes_accessed = (B * obs_dim * 4 + B * HID2 * out_bytes          # in / out
                      + (obs_dim * HID1 + HID1 * HID2) * 2            # bf16 W
                      + 8 * (HID1 + HID2) * 4                         # packed aux
                      + 2 * HID2 * NGROUPS * 2)                       # group mats

    out = pl.pallas_call(
        encoder_kernel,
        out_shape=jax.ShapeDtypeStruct((B, HID2), out_dtype),
        grid_spec=pltpu.PrefetchScalarGridSpec(
            num_scalar_prefetch=0,
            grid=(B // tile_b,),
            in_specs=[
                pl.BlockSpec((tile_b, obs_dim), row),      # obs tile
                pl.BlockSpec((obs_dim, HID1), full),       # W1^T (bf16)
                pl.BlockSpec((8, HID1), full),             # b1/g1/be1 packed
                pl.BlockSpec((HID1, HID2), full),          # W2^T (bf16)
                pl.BlockSpec((8, HID2), full),             # b2/g2/be2 packed
                pl.BlockSpec((HID2, NGROUPS), full),       # simnorm group-sum
                pl.BlockSpec((NGROUPS, HID2), full),       # simnorm group-bcast
            ],
            out_specs=pl.BlockSpec((tile_b, HID2), row),   # lane-dense output
        ),
        compiler_params=pltpu.CompilerParams(
            dimension_semantics=("parallel",),
            vmem_limit_bytes=32 * 1024 * 1024),            # > v5e's 16 MiB default
        cost_estimate=pl.CostEstimate(flops=flops,
                                      transcendentals=transcendentals,
                                      bytes_accessed=bytes_accessed),
    )(obs,
      prep["w1t"], prep["p1"],
      prep["w2t"], prep["p2"],
      prep["gdn"], prep["gup"])
    return out


# ----------------------- init + plain-JAX reference ----------------------

def init_params(key, obs_dim):
    """PyTorch-layout params (W: (out, in), b: (out,)), uniform fan-in init."""
    ks = jax.random.split(key, 4)

    def lin(kw, kb, out_f, in_f):
        bound = 1.0 / float(in_f) ** 0.5
        w = jax.random.uniform(kw, (out_f, in_f), jnp.float32, -bound, bound)
        b = jax.random.uniform(kb, (out_f,), jnp.float32, -bound, bound)
        return w, b

    w1, b1 = lin(ks[0], ks[1], HID1, obs_dim)
    w2, b2 = lin(ks[2], ks[3], HID2, HID1)
    return {
        "w1": w1, "b1": b1,
        "g1": jnp.ones((HID1,), jnp.float32),
        "be1": jnp.zeros((HID1,), jnp.float32),
        "w2": w2, "b2": b2,
        "g2": jnp.ones((HID2,), jnp.float32),
        "be2": jnp.zeros((HID2,), jnp.float32),
    }


def reference_forward(obs, params):
    """Pure-JAX f32 reference matching the PyTorch Encoder."""
    h = obs @ params["w1"].T + params["b1"]
    h = _mish_ref(_layernorm_ref(h, params["g1"], params["be1"]))
    h = h @ params["w2"].T + params["b2"]
    h = _layernorm_ref(h, params["g2"], params["be2"])
    B, D = h.shape
    h = jax.nn.softmax(h.reshape(B, D // SIMNORM_DIM, SIMNORM_DIM), axis=-1)
    return h.reshape(B, D)


# --------------------------------- demo ----------------------------------

if __name__ == "__main__":
    key = jax.random.PRNGKey(0)
    k_obs, k_par = jax.random.split(key)

    # 8 grid steps -> >= 4 steps per TensorCore on v7x (both cores pipeline).
    B, obs_dim, tile_b = 256, 32, 32
    obs = jax.random.normal(k_obs, (B, obs_dim), jnp.float32)
    params = init_params(k_par, obs_dim)
    prep = prepare_params(params)

    out = encoder_forward(obs, prep, tile_b=tile_b, out_dtype=jnp.float32)
    out = jax.block_until_ready(out)

    ref = reference_forward(obs, params)
    assert out.shape == (B, HID2), out.shape
    # bf16 MXU operands + approx reciprocals -> loosened tolerance vs f32 ref.
    max_err = jnp.max(jnp.abs(out - ref))
    assert jnp.allclose(out, ref, atol=2e-2, rtol=2e-2), (
        f"max abs err {max_err}")

    print("KERNEL_OK")
</pallas_src>

<mosaic_0001>
module attributes {stable_mosaic.version = 11 : i64} {
  func.func @encoder_kernel(%arg0: i32, %arg1: memref<32x32xf32, #tpu.memory_space<vmem>>, %arg2: memref<32x256xbf16, #tpu.memory_space<vmem>>, %arg3: memref<8x256xf32, #tpu.memory_space<vmem>>, %arg4: memref<256x512xbf16, #tpu.memory_space<vmem>>, %arg5: memref<8x512xf32, #tpu.memory_space<vmem>>, %arg6: memref<512x64xbf16, #tpu.memory_space<vmem>>, %arg7: memref<64x512xbf16, #tpu.memory_space<vmem>>, %arg8: memref<32x512xf32, #tpu.memory_space<vmem>>) attributes {dimension_semantics = [#tpu.dimension_semantics<parallel>], iteration_bounds = array<i64: 8>, scalar_prefetch = 0 : i64, scratch_operands = 0 : i64, tpu.core_type = #tpu.core_type<tc>, window_params = [{transform_indices = @transform_0, window_bounds = array<i64: 32, 32>}, {pipeline_mode = #tpu.pipeline_mode<synchronous>, transform_indices = @transform_1, window_bounds = array<i64: 32, 256>}, {pipeline_mode = #tpu.pipeline_mode<synchronous>, transform_indices = @transform_2, window_bounds = array<i64: 8, 256>}, {pipeline_mode = #tpu.pipeline_mode<synchronous>, transform_indices = @transform_3, window_bounds = array<i64: 256, 512>}, {pipeline_mode = #tpu.pipeline_mode<synchronous>, transform_indices = @transform_4, window_bounds = array<i64: 8, 512>}, {pipeline_mode = #tpu.pipeline_mode<synchronous>, transform_indices = @transform_5, window_bounds = array<i64: 512, 64>}, {pipeline_mode = #tpu.pipeline_mode<synchronous>, transform_indices = @transform_6, window_bounds = array<i64: 64, 512>}, {transform_indices = @transform_7, window_bounds = array<i64: 32, 512>}]} {
    %c0 = arith.constant 0 : index
    %c0_0 = arith.constant 0 : index
    %0 = vector.load %arg1[%c0, %c0_0] : memref<32x32xf32, #tpu.memory_space<vmem>>, vector<32x32xf32>
    %1 = arith.truncf %0 : vector<32x32xf32> to vector<32x32xbf16>
    %c0_1 = arith.constant 0 : index
    %c0_2 = arith.constant 0 : index
    %2 = vector.load %arg2[%c0_1, %c0_2] : memref<32x256xbf16, #tpu.memory_space<vmem>>, vector<32x256xbf16>
    %cst = arith.constant dense<0.000000e+00> : vector<32x256xf32>
    %3 = tpu.matmul %1, %2, %cst {dimension_numbers = #tpu.dot_dimension_numbers<[1], [0], [0], [1], [0, 0, 1, 1], [], []>} : vector<32x32xbf16>, vector<32x256xbf16>, vector<32x256xf32> -> vector<32x256xf32>
    %c0_3 = arith.constant 0 : index
    %c0_4 = arith.constant 0 : index
    %4 = vector.load %arg3[%c0_3, %c0_4] : memref<8x256xf32, #tpu.memory_space<vmem>>, vector<1x256xf32>
    %5 = vector.broadcast %4 : vector<1x256xf32> to vector<32x256xf32>
    %6 = arith.addf %3, %5 : vector<32x256xf32>
    %c1 = arith.constant 1 : index
    %c0_5 = arith.constant 0 : index
    %7 = vector.load %arg3[%c1, %c0_5] : memref<8x256xf32, #tpu.memory_space<vmem>>, vector<1x256xf32>
    %c2 = arith.constant 2 : index
    %c0_6 = arith.constant 0 : index
    %8 = vector.load %arg3[%c2, %c0_6] : memref<8x256xf32, #tpu.memory_space<vmem>>, vector<1x256xf32>
    %cst_7 = arith.constant dense<0.000000e+00> : vector<32xf32>
    %9 = vector.multi_reduction <add>, %6, %cst_7 [1] : vector<32x256xf32> to vector<32xf32>
    %10 = vector.shape_cast %9 : vector<32xf32> to vector<32x1xf32>
    %cst_8 = arith.constant 2.560000e+02 : f32
    %11 = vector.broadcast %cst_8 : f32 to vector<32x1xf32>
    %12 = arith.divf %10, %11 : vector<32x1xf32>
    %13 = arith.mulf %6, %6 : vector<32x256xf32>
    %cst_9 = arith.constant dense<0.000000e+00> : vector<32xf32>
    %14 = vector.multi_reduction <add>, %13, %cst_9 [1] : vector<32x256xf32> to vector<32xf32>
    %15 = vector.shape_cast %14 : vector<32xf32> to vector<32x1xf32>
    %cst_10 = arith.constant 2.560000e+02 : f32
    %16 = vector.broadcast %cst_10 : f32 to vector<32x1xf32>
    %17 = arith.divf %15, %16 : vector<32x1xf32>
    %18 = arith.mulf %12, %12 : vector<32x1xf32>
    %19 = arith.subf %17, %18 : vector<32x1xf32>
    %cst_11 = arith.constant 0.000000e+00 : f32
    %20 = vector.broadcast %cst_11 : f32 to vector<32x1xf32>
    %21 = arith.maximumf %19, %20 : vector<32x1xf32>
    %22 = vector.broadcast %12 : vector<32x1xf32> to vector<32x256xf32>
    %23 = arith.subf %6, %22 : vector<32x256xf32>
    %cst_12 = arith.constant 9.99999974E-6 : f32
    %24 = vector.broadcast %cst_12 : f32 to vector<32x1xf32>
    %25 = arith.addf %21, %24 : vector<32x1xf32>
    %26 = math.rsqrt %25 : vector<32x1xf32>
    %27 = vector.broadcast %26 : vector<32x1xf32> to vector<32x256xf32>
    %28 = arith.mulf %23, %27 : vector<32x256xf32>
    %29 = vector.broadcast %7 : vector<1x256xf32> to vector<32x256xf32>
    %30 = arith.mulf %28, %29 : vector<32x256xf32>
    %31 = vector.broadcast %8 : vector<1x256xf32> to vector<32x256xf32>
    %32 = arith.addf %30, %31 : vector<32x256xf32>
    %cst_13 = arith.constant 3.000000e+01 : f32
    %33 = vector.broadcast %cst_13 : f32 to vector<32x256xf32>
    %34 = arith.minimumf %32, %33 : vector<32x256xf32>
    %35 = math.exp %34 : vector<32x256xf32>
    %cst_14 = arith.constant 1.000000e+00 : f32
    %36 = vector.broadcast %cst_14 : f32 to vector<32x256xf32>
    %37 = arith.addf %36, %35 : vector<32x256xf32>
    %cst_15 = arith.constant 1.000000e+00 : f32
    %38 = vector.broadcast %cst_15 : f32 to vector<32x256xf32>
    %39 = arith.addf %38, %35 : vector<32x256xf32>
    %40 = arith.mulf %37, %39 : vector<32x256xf32>
    %cst_16 = arith.constant 1.000000e+00 : f32
    %41 = vector.broadcast %cst_16 : f32 to vector<32x256xf32>
    %42 = arith.addf %40, %41 : vector<32x256xf32>
    %43 = tpu.reciprocal %42 {approx = true} : vector<32x256xf32> -> vector<32x256xf32>
    %cst_17 = arith.constant 2.000000e+00 : f32
    %44 = vector.broadcast %cst_17 : f32 to vector<32x256xf32>
    %45 = arith.mulf %44, %43 : vector<32x256xf32>
    %cst_18 = arith.constant 1.000000e+00 : f32
    %46 = vector.broadcast %cst_18 : f32 to vector<32x256xf32>
    %47 = arith.subf %46, %45 : vector<32x256xf32>
    %48 = arith.mulf %32, %47 : vector<32x256xf32>
    %49 = arith.truncf %48 : vector<32x256xf32> to vector<32x256xbf16>
    %c0_19 = arith.constant 0 : index
    %c0_20 = arith.constant 0 : index
    %50 = vector.load %arg4[%c0_19, %c0_20] : memref<256x512xbf16, #tpu.memory_space<vmem>>, vector<256x512xbf16>
    %cst_21 = arith.constant dense<0.000000e+00> : vector<32x512xf32>
    %51 = tpu.matmul %49, %50, %cst_21 {dimension_numbers = #tpu.dot_dimension_numbers<[1], [0], [0], [1], [0, 0, 1, 1], [], []>} : vector<32x256xbf16>, vector<256x512xbf16>, vector<32x512xf32> -> vector<32x512xf32>
    %c0_22 = arith.constant 0 : index
    %c0_23 = arith.constant 0 : index
    %52 = vector.load %arg5[%c0_22, %c0_23] : memref<8x512xf32, #tpu.memory_space<vmem>>, vector<1x512xf32>
    %53 = vector.broadcast %52 : vector<1x512xf32> to vector<32x512xf32>
    %54 = arith.addf %51, %53 : vector<32x512xf32>
    %c1_24 = arith.constant 1 : index
    %c0_25 = arith.constant 0 : index
    %55 = vector.load %arg5[%c1_24, %c0_25] : memref<8x512xf32, #tpu.memory_space<vmem>>, vector<1x512xf32>
    %c2_26 = arith.constant 2 : index
    %c0_27 = arith.constant 0 : index
    %56 = vector.load %arg5[%c2_26, %c0_27] : memref<8x512xf32, #tpu.memory_space<vmem>>, vector<1x512xf32>
    %cst_28 = arith.constant dense<0.000000e+00> : vector<32xf32>
    %57 = vector.multi_reduction <add>, %54, %cst_28 [1] : vector<32x512xf32> to vector<32xf32>
    %58 = vector.shape_cast %57 : vector<32xf32> to vector<32x1xf32>
    %cst_29 = arith.constant 5.120000e+02 : f32
    %59 = vector.broadcast %cst_29 : f32 to vector<32x1xf32>
    %60 = arith.divf %58, %59 : vector<32x1xf32>
    %61 = arith.mulf %54, %54 : vector<32x512xf32>
    %cst_30 = arith.constant dense<0.000000e+00> : vector<32xf32>
    %62 = vector.multi_reduction <add>, %61, %cst_30 [1] : vector<32x512xf32> to vector<32xf32>
    %63 = vector.shape_cast %62 : vector<32xf32> to vector<32x1xf32>
    %cst_31 = arith.constant 5.120000e+02 : f32
    %64 = vector.broadcast %cst_31 : f32 to vector<32x1xf32>
    %65 = arith.divf %63, %64 : vector<32x1xf32>
    %66 = arith.mulf %60, %60 : vector<32x1xf32>
    %67 = arith.subf %65, %66 : vector<32x1xf32>
    %cst_32 = arith.constant 0.000000e+00 : f32
    %68 = vector.broadcast %cst_32 : f32 to vector<32x1xf32>
    %69 = arith.maximumf %67, %68 : vector<32x1xf32>
    %70 = vector.broadcast %60 : vector<32x1xf32> to vector<32x512xf32>
    %71 = arith.subf %54, %70 : vector<32x512xf32>
    %cst_33 = arith.constant 9.99999974E-6 : f32
    %72 = vector.broadcast %cst_33 : f32 to vector<32x1xf32>
    %73 = arith.addf %69, %72 : vector<32x1xf32>
    %74 = math.rsqrt %73 : vector<32x1xf32>
    %75 = vector.broadcast %74 : vector<32x1xf32> to vector<32x512xf32>
    %76 = arith.mulf %71, %75 : vector<32x512xf32>
    %77 = vector.broadcast %55 : vector<1x512xf32> to vector<32x512xf32>
    %78 = arith.mulf %76, %77 : vector<32x512xf32>
    %79 = vector.broadcast %56 : vector<1x512xf32> to vector<32x512xf32>
    %80 = arith.addf %78, %79 : vector<32x512xf32>
    %cst_34 = arith.constant dense<0xFF800000> : vector<32xf32>
    %81 = vector.multi_reduction <maximumf>, %80, %cst_34 [1] : vector<32x512xf32> to vector<32xf32>
    %82 = vector.shape_cast %81 : vector<32xf32> to vector<32x1xf32>
    %83 = vector.broadcast %82 : vector<32x1xf32> to vector<32x512xf32>
    %84 = arith.subf %80, %83 : vector<32x512xf32>
    %cst_35 = arith.constant -8.000000e+01 : f32
    %85 = vector.broadcast %cst_35 : f32 to vector<32x512xf32>
    %86 = arith.maximumf %84, %85 : vector<32x512xf32>
    %87 = math.exp %86 : vector<32x512xf32>
    %88 = arith.truncf %87 : vector<32x512xf32> to vector<32x512xbf16>
    %c0_36 = arith.constant 0 : index
    %c0_37 = arith.constant 0 : index
    %89 = vector.load %arg6[%c0_36, %c0_37] : memref<512x64xbf16, #tpu.memory_space<vmem>>, vector<512x64xbf16>
    %cst_38 = arith.constant dense<0.000000e+00> : vector<32x64xf32>
    %90 = tpu.matmul %88, %89, %cst_38 {dimension_numbers = #tpu.dot_dimension_numbers<[1], [0], [0], [1], [0, 0, 1, 1], [], []>} : vector<32x512xbf16>, vector<512x64xbf16>, vector<32x64xf32> -> vector<32x64xf32>
    %91 = tpu.reciprocal %90 {approx = true} : vector<32x64xf32> -> vector<32x64xf32>
    %92 = arith.truncf %91 : vector<32x64xf32> to vector<32x64xbf16>
    %c0_39 = arith.constant 0 : index
    %c0_40 = arith.constant 0 : index
    %93 = vector.load %arg7[%c0_39, %c0_40] : memref<64x512xbf16, #tpu.memory_space<vmem>>, vector<64x512xbf16>
    %cst_41 = arith.constant dense<0.000000e+00> : vector<32x512xf32>
    %94 = tpu.matmul %92, %93, %cst_41 {dimension_numbers = #tpu.dot_dimension_numbers<[1], [0], [0], [1], [0, 0, 1, 1], [], []>} : vector<32x64xbf16>, vector<64x512xbf16>, vector<32x512xf32> -> vector<32x512xf32>
    %95 = arith.mulf %87, %94 : vector<32x512xf32>
    %c0_42 = arith.constant 0 : index
    %c0_43 = arith.constant 0 : index
    %96 = vector.load %arg8[%c0_42, %c0_43] : memref<32x512xf32, #tpu.memory_space<vmem>>, vector<32x512xf32>
    tpu.vector_store %arg8[%c0_42, %c0_43], %95 {strides = array<i32>} : memref<32x512xf32, #tpu.memory_space<vmem>>, vector<32x512xf32>,
    return
  }
  func.func @transform_0(%arg0: i32) -> (i32, i32) {
    %c0_i32 = arith.constant 0 : i32
    %c0_i32_0 = arith.constant 0 : i32
    return %arg0, %c0_i32 : i32, i32
  }
  func.func @transform_1(%arg0: i32) -> (i32, i32) {
    %c0_i32 = arith.constant 0 : i32
    %c0_i32_0 = arith.constant 0 : i32
    %c0_i32_1 = arith.constant 0 : i32
    return %c0_i32, %c0_i32_0 : i32, i32
  }
  func.func @transform_2(%arg0: i32) -> (i32, i32) {
    %c0_i32 = arith.constant 0 : i32
    %c0_i32_0 = arith.constant 0 : i32
    %c0_i32_1 = arith.constant 0 : i32
    return %c0_i32, %c0_i32_0 : i32, i32
  }
  func.func @transform_3(%arg0: i32) -> (i32, i32) {
    %c0_i32 = arith.constant 0 : i32
    %c0_i32_0 = arith.constant 0 : i32
    %c0_i32_1 = arith.constant 0 : i32
    return %c0_i32, %c0_i32_0 : i32, i32
  }
  func.func @transform_4(%arg0: i32) -> (i32, i32) {
    %c0_i32 = arith.constant 0 : i32
    %c0_i32_0 = arith.constant 0 : i32
    %c0_i32_1 = arith.constant 0 : i32
    return %c0_i32, %c0_i32_0 : i32, i32
  }
  func.func @transform_5(%arg0: i32) -> (i32, i32) {
    %c0_i32 = arith.constant 0 : i32
    %c0_i32_0 = arith.constant 0 : i32
    %c0_i32_1 = arith.constant 0 : i32
    return %c0_i32, %c0_i32_0 : i32, i32
  }
  func.func @transform_6(%arg0: i32) -> (i32, i32) {
    %c0_i32 = arith.constant 0 : i32
    %c0_i32_0 = arith.constant 0 : i32
    %c0_i32_1 = arith.constant 0 : i32
    return %c0_i32, %c0_i32_0 : i32, i32
  }
  func.func @transform_7(%arg0: i32) -> (i32, i32) {
    %c0_i32 = arith.constant 0 : i32
    %c0_i32_0 = arith.constant 0 : i32
    return %arg0, %c0_i32 : i32, i32
  }
}

</mosaic_0001>

<bundles_post_ra>
// kernel: encoder_forward.1
= control target key start
LH: loop header
LB: loop body
LE: loop exit
PB: predicated region body
PF: predicated region fallthrough
CT: control target
= control target key end

     0   :  { %12 = vsyncpa [#allocation3], 0  ;;  %s3561_s0 = inlined_call_operand.vmem [shape: f32[256,32], index: 0, kind: input, shape index: {}]   ;;  %s3562_s1 = inlined_call_operand.vmem [shape: bf16[32,256], index: 1, kind: input, shape index: {}]   ;;  %s3563_s2 = inlined_call_operand.vmem [shape: f32[8,256], index: 2, kind: input, shape index: {}]   ;;  %s3564_s3 = inlined_call_operand.vmem [shape: bf16[256,512], index: 3, kind: input, shape index: {}]   ;;  %s3565_s4 = inlined_call_operand.vmem [shape: f32[8,512], index: 4, kind: input, shape index: {}]   ;;  %s3566_s5 = inlined_call_operand.vmem [shape: bf16[512,64], index: 5, kind: input, shape index: {}]   ;;  %s3567_s6 = inlined_call_operand.vmem [shape: bf16[64,512], index: 6, kind: input, shape index: {}]   ;;  %s3568_s7 = inlined_call_operand.hbm [shape: f32[256,512], index: 7, kind: output, shape index: {}]  }
   0x1   :  { %14 = vsyncpa [#allocation3 + $0x1], 0  ;;  %s2656_s24 = smov 0   ;;  %s2658_s25 = smov 0  }
   0x2   :  { %s2660_s26 = smov 0   ;;  %s2662_s27 = smov 0  }
   0x3 LB: > { %s2677_s28 = sadd.s32 4294967295, %s2610_s27   ;;  %s2063_s29 = sadd.s32 4294967294, %s2610_s27   ;;  %s2610_s27 = sphi %s2662_s27, %s3574_s27   ;;  %s2606_s26 = sphi %s2660_s26, %s3573_s26   ;;  %s2602_s25 = sphi %s2658_s25, %s3572_s25   ;;  %s2598_s24 = sphi %s2656_s24, %s3571_s24  }
   0x4   : > { %s2681_s30 = sadd.s32 1, %s2610_s27   ;;  %s179_s8 = sadd.s32 1, %s2606_s26 }
   0x5   : > { %s176_s9 = ssub.s32 %s2610_s27, %s2681_s30  ;;  %p189_p0 = scmp.ne.s32.totalorder %s2606_s26, %s2602_s25 }
   0x6   : > { %p177_p1 = scmp.eq.s32.totalorder %s176_s9, 0  ;;  %p190_p2 = scmp.eq.s32.totalorder %s2677_s28, 7 }
   0x7   : > { %p195_p3 = scmp.ne.s32.totalorder %s2602_s25, %s2598_s24  ;;  %p196_p4 = scmp.eq.s32.totalorder %s2063_s29, 7 }
   0x8   : > { %s2692_s10 = scalar_select %p177_p1, %s2606_s26, %s179_s8  }
   0x9   : > { %p2694_p5 = por %p190_p2, %p189_p0  ;;  %p2698_p6 = por %p196_p4, %p195_p3 }
   0xa   : > { %p2066_p7 = scmp.ge.s32.totalorder %s2610_s27, 1  ;;  %p241_p8 = scmp.lt.s32.totalorder %s2610_s27, 9 }
   0xc   : > { %p242_p9 = pnand %p2066_p7, %p241_p8 }
   0xd   : > { %v2302_v0 = vld [vmem:[%s3562_s1 + $0x4] ss:$8 sps:$4 sm:$0xff] (!%p242_p9)   ;;  %s2068_s15 = sshll.u32 (!%p242_p9), %s2677_s28, 2  ;;  %v2304_v1 = vld [vmem:[%s3562_s1] ss:$8 sps:$4 sm:$0xff] (!%p242_p9)   ;;  %v2612_v2 = vmov (!%p242_p9), 0   ;;  %v293_v11 = vlaneseq (!%p242_p9) }
   0xe   : > { %245 = sbr.rel (%p242_p9) target bundleno = 1498 (0x5da), region = 48  ;;  %362 = vmatprep.mubr.bf16.mxu0 (!%p242_p9), %v2612_v2  ;;  %p274_p10 = scmp.lt.s32.totalorder (!%p242_p9), %s2068_s15, 31  ;;  %330 = vmatprep.subr.bf16.mxu0 (!%p242_p9), %v2302_v0  ;;  %v2305_v3 = vld [vmem:[%s3562_s1 + $0x14] ss:$8 sps:$4 sm:$0xff] (!%p242_p9)   ;;  %v2307_v4 = vld [vmem:[%s3562_s1 + $0x10] ss:$8 sps:$4 sm:$0xff] (!%p242_p9)  }
   0xf   : > { %331 = vmatpush1.bf16.msra.mxu0 (!%p242_p9), %v2304_v1  ;;  %vm323_vm0 = vcmask (!%p242_p9), 261120   ;;  %v2722_v12 = vshrl.u32 (!%p242_p9), %v293_v11, 7  ;;  %v291_v14 = vld [vmem:[%s3563_s2] ss:$8 sm:$0x3] (!%p242_p9)  ;;  %vm1841_vm1 = vcmask (!%p242_p9), 523264  }
  0x10   : > { %332 = vmatprep.subr.bf16.mxu0 (!%p242_p9), %v2305_v3  ;;  %v2308_v50 = vld [vmem:[%s3564_s3 + $0x4] ss:$16 sps:$4 sm:$0xff] (!%p242_p9)   ;;  %v2312_v51 = vld [vmem:[%s3564_s3 + $0xc] ss:$16 sps:$4 sm:$0xff] (!%p242_p9)   ;;  %v2310_v52 = vld [vmem:[%s3564_s3 + $0x8] ss:$16 sps:$4 sm:$0xff] (!%p242_p9)  }
  0x11   : > { %v2725_v13 = vsub.s32 (!%p242_p9), 0, %v2722_v12  ;;  %v2731_v15 = vsub.s32 (!%p242_p9), 1, %v2722_v12  ;;  %v2313_v53 = vld [vmem:[%s3564_s3] ss:$16 sps:$4 sm:$0xff] (!%p242_p9)   ;;  %992 = vmatprep.subr.bf16.mxu1 (!%p242_p9), %v2308_v50  ;;  %v2314_v54 = vld [vmem:[%s3564_s3 + $0x24] ss:$16 sps:$4 sm:$0xff] (!%p242_p9)  }
  0x12   : > { %993 = vmatpush1.bf16.msra.mxu1 (!%p242_p9), %v2313_v53  ;;  %v2318_v55 = vld [vmem:[%s3564_s3 + $0x2c] ss:$16 sps:$4 sm:$0xff] (!%p242_p9)   ;;  %v2316_v56 = vld [vmem:[%s3564_s3 + $0x28] ss:$16 sps:$4 sm:$0xff] (!%p242_p9)   ;;  %v2319_v57 = vld [vmem:[%s3564_s3 + $0x20] ss:$16 sps:$4 sm:$0xff] (!%p242_p9)  }
  0x13   : > { %333 = vmatpush1.bf16.msra.mxu0 (!%p242_p9), %v2307_v4  ;;  %v296_v16 = vrot.slane (!%p242_p9), %v291_v14, %v2725_v13  ;;  %v300_v17 = vrot.slane (!%p242_p9), %v291_v14, %v2731_v15  ;;  %994 = vmatprep.subr.bf16.mxu1 (!%p242_p9), %v2314_v54  ;;  %v2320_v58 = vld [vmem:[%s3564_s3 + $0x44] ss:$16 sps:$4 sm:$0xff] (!%p242_p9)   ;;  %v2324_v59 = vld [vmem:[%s3564_s3 + $0x4c] ss:$16 sps:$4 sm:$0xff] (!%p242_p9)   ;;  %v2322_v60 = vld [vmem:[%s3564_s3 + $0x48] ss:$16 sps:$4 sm:$0xff] (!%p242_p9)  }
  0x14   : > { %1045 = vmatprep.subr.bf16.mxu0 (!%p242_p9), %v2312_v51  ;;  %v2325_v61 = vld [vmem:[%s3564_s3 + $0x40] ss:$16 sps:$4 sm:$0xff] (!%p242_p9)   ;;  %v2326_v62 = vld [vmem:[%s3564_s3 + $0x64] ss:$16 sps:$4 sm:$0xff] (!%p242_p9)   ;;  %v2330_v63 = vld [vmem:[%s3564_s3 + $0x6c] ss:$16 sps:$4 sm:$0xff] (!%p242_p9)  }
  0x15   : > { %s3576_s15 = smov (!%p274_p10, %s2068_s15), 31  ;;  %v2328_v0 = vld [vmem:[%s3564_s3 + $0x68] ss:$16 sps:$4 sm:$0xff]   ;;  %v2331_v1 = vld [vmem:[%s3564_s3 + $0x60] ss:$16 sps:$4 sm:$0xff]   ;;  %s270_s29 = sand.u32 1, %s2602_s25  }
  0x16   : > { %s2069_s22 = sshll.u32 %s3576_s15, 3  ;;  %995 = vmatpush1.bf16.msra.mxu1 %v2319_v57  ;;  %v2332_v3 = vld [vmem:[%s3564_s3 + $0x84] ss:$16 sps:$4 sm:$0xff]   ;;  %v2334_v4 = vld [vmem:[%s3564_s3 + $0x88] ss:$16 sps:$4 sm:$0xff]   ;;  %s2203_s13 = sshll.u32 %s2677_s28, 11 }
  0x17   : > { %s277_s8 = scalar_lea.vmem %s3561_s0, %s2069_s22  ;;  %996 = vmatprep.subr.bf16.mxu1 %v2320_v58  ;;  %v2344_v11 = vld [vmem:[%s3564_s3 + $0xc4] ss:$16 sps:$4 sm:$0xff]   ;;  %v2348_v14 = vld [vmem:[%s3564_s3 + $0xcc] ss:$16 sps:$4 sm:$0xff]   ;;  %v2391_v53 = vld [vmem:[%s3564_s3 + $0x1a0] ss:$16 sps:$4 sm:$0xff]   ;;  %s3506_s16 = scalar_lea.hbm %s3568_s7, %s2203_s13 }
  0x18   : > { %v281_v5 = vld [vmem:[%s277_s8] sm:$0xff]  ;;  %v282_v6 = vld [vmem:[%s277_s8 + $0x8] sm:$0xff]  ;;  %v283_v8 = vld [vmem:[%s277_s8 + $0x10] sm:$0xff]  ;;  %s3520_s17 = scalar_lea.sflag [#allocation3], %s270_s29  ;;  %s2613_s19 = smov [#allocation2]  }
  0x19   : > { %v285_v7 = vpack.c.bf16 %v282_v6, %v281_v5  ;;  %v284_v9 = vld [vmem:[%s277_s8 + $0x18] sm:$0xff]  ;;  %v2337_v6 = vld [vmem:[%s3564_s3 + $0x80] ss:$16 sps:$4 sm:$0xff]   ;;  %v2386_v50 = vld [vmem:[%s3564_s3 + $0x1a4] ss:$16 sps:$4 sm:$0xff]   ;;  %s2067_s8 = sshll.u32 %s270_s29, 7 }
  0x1a   : > { %v286_v10 = vpack.c.bf16 %v284_v9, %v283_v8  ;;  %997 = vmatpush1.bf16.msra.mxu1 %v2325_v61  ;;  %v2336_v5 = vld [vmem:[%s3564_s3 + $0x8c] ss:$16 sps:$4 sm:$0xff]   ;;  %v2340_v9 = vld [vmem:[%s3564_s3 + $0xa8] ss:$16 sps:$4 sm:$0xff]   ;;  %v2392_v54 = vld [vmem:[%s3564_s3 + $0x1c4] ss:$16 sps:$4 sm:$0xff]  }
  0x1b   : > { %2074 = vmatmul.mubr.msk.bf16.vlgmr.msra.gmra.mrb[0].mxu0 %vm323_vm0, %v285_v7  ;;  %998 = vmatprep.subr.bf16.mxu1 %v2326_v62  ;;  %v2338_v7 = vld [vmem:[%s3564_s3 + $0xa4] ss:$16 sps:$4 sm:$0xff]   ;;  %v2342_v8 = vld [vmem:[%s3564_s3 + $0xac] ss:$16 sps:$4 sm:$0xff]   ;;  %v2397_v57 = vld [vmem:[%s3564_s3 + $0x1c0] ss:$16 sps:$4 sm:$0xff]  }
  0x1c   : > { %372 = vmatprep.mubr.bf16.mxu0 %v2612_v2  ;;  %1046 = vmatpush1.bf16.msra.mxu0 %v2310_v52  ;;  %v2390_v51 = vld [vmem:[%s3564_s3 + $0x1ac] ss:$16 sps:$4 sm:$0xff]   ;;  %v2388_v52 = vld [vmem:[%s3564_s3 + $0x1a8] ss:$16 sps:$4 sm:$0xff]   ;;  %v2398_v58 = vld [vmem:[%s3564_s3 + $0x1e4] ss:$16 sps:$4 sm:$0xff]  }
  0x1d   : > { %1047 = vmatprep.subr.bf16.mxu0 %v2318_v55  ;;  %v2396_v55 = vld [vmem:[%s3564_s3 + $0x1cc] ss:$16 sps:$4 sm:$0xff]   ;;  %v2403_v61 = vld [vmem:[%s3564_s3 + $0x1e0] ss:$16 sps:$4 sm:$0xff]   ;;  %s3479_s9 = scalar_lea.vmem [#allocation2], %s2067_s8  ;;  %s2552_s20 = sshll.u32 %s2613_s19, 4  ;;  %s2553_s20 = int_to_ptr.vmem [resolvable:$false] %s2552_s20 }
  0x1e   : > { %999 = vmatpush1.bf16.msra.mxu1 %v2331_v1  ;;  %s2001_s14 = sshll.u32 %s3479_s9, 4  ;;  %s2554_s21 = scalar_lea.vmem %s2553_s20, 4096  ;;  %s3508_s14 = int_to_ptr.vmem [resolvable:$true] %s2001_s14 }
  0x1f   : > { %1000 = vmatprep.subr.bf16.mxu1 %v2332_v3  ;;  %s2548_s18 = scalar_lea.vmem %s3508_s14, 2048  ;;  %p2555_p0 = scmp.lt.s32.totalorder %s3508_s14, %s2553_s20 }
  0x20   : > { %1048 = vmatpush1.bf16.msra.mxu0 %v2316_v56  ;;  %v2394_v56 = vld [vmem:[%s3564_s3 + $0x1c8] ss:$16 sps:$4 sm:$0xff]   ;;  %p2549_p11 = scmp.ne.s32.totalorder %s3508_s14, %s2548_s18  ;;  %p2556_p1 = scmp.lt.s32.totalorder %s2554_s21, %s2548_s18 }
  0x21   : > { %1049 = vmatprep.subr.bf16.mxu0 %v2324_v59  ;;  %v2402_v59 = vld [vmem:[%s3564_s3 + $0x1ec] ss:$16 sps:$4 sm:$0xff]  }
  0x22   : > { %1001 = vmatpush1.bf16.msra.mxu1 %v2337_v6  ;;  %p2550_p12 = pnand %p2549_p11, %p2694_p5  ;;  %p2557_p2 = por %p2556_p1, %p2555_p0 }
  0x23   : > { %2075 = vmatmul.mubr.msk.bf16.gmra.mrb[4].mxu0 %vm323_vm0, %v286_v10  ;;  %v2343_v10 = vld [vmem:[%s3564_s3 + $0xa0] ss:$16 sps:$4 sm:$0xff]   ;;  %1002 = vmatprep.subr.bf16.mxu1 %v2338_v7 }
  0x24   : > { %1050 = vmatpush1.bf16.msra.mxu0 %v2322_v60  ;;  %v2400_v60 = vld [vmem:[%s3564_s3 + $0x1e8] ss:$16 sps:$4 sm:$0xff]   ;;  %p2551_p13 = pneg %p2550_p12 }
  0x25   : > { %1051 = vmatprep.subr.bf16.mxu0 %v2330_v63 }
  0x26   : > { %1003 = vmatpush1.bf16.msra.mxu1 %v2343_v10  ;;  %p2558_p3 = pnand %p2557_p2, %p2551_p13 }
  0x27   : > { %1004 = vmatprep.subr.bf16.mxu1 %v2344_v11 }
  0x28   : > { %1052 = vmatpush1.bf16.msra.mxu0 %v2328_v0 }
  0x29   : > { %1053 = vmatprep.subr.bf16.mxu0 %v2336_v5 }
  0x2c   : > { %1054 = vmatpush1.bf16.msra.mxu0 %v2334_v4 }
  0x2d   : > { %1055 = vmatprep.subr.bf16.mxu0 %v2342_v8 }
  0x30   : > { %1056 = vmatpush1.bf16.msra.mxu0 %v2340_v9 }
  0x31   : > { %1057 = vmatprep.subr.bf16.mxu0 %v2348_v14 }
  0xee   : > { %v364_v18 = vpop.f32.mrb[0].mxu0 }
  0xef   : > { %v2735_v19 = vadd.f32 %v364_v18, %v296_v16  ;;  %v366_v20 = vpop.f32.mrb[1].mxu0  ;;  %v2350_v18 = vld [vmem:[%s3564_s3 + $0xe4] ss:$16 sps:$4 sm:$0xff]  }
  0xf0   : > { %v2737_v21 = vadd.f32 %v366_v20, %v300_v17  ;;  %v368_v22 = vpop.f32.mrb[2].mxu0  ;;  %v2354_v20 = vld [vmem:[%s3564_s3 + $0xec] ss:$16 sps:$4 sm:$0xff]  }
  0xf1   : > { %v2739_v23 = vadd.f32 %v368_v22, %v296_v16  ;;  %v370_v24 = vpop.f32.mrb[3].mxu0  ;;  %v404_v25 = vmul.f32 %v2735_v19, %v2735_v19  ;;  %v2352_v22 = vld [vmem:[%s3564_s3 + $0xe8] ss:$16 sps:$4 sm:$0xff]  }
  0xf2   : > { %v2743_v26 = vadd.f32 %v370_v24, %v300_v17  ;;  %v387_v27 = vadd.f32 %v2737_v21, %v2735_v19  ;;  %v405_v28 = vmul.f32 %v2737_v21, %v2737_v21  ;;  %v2355_v24 = vld [vmem:[%s3564_s3 + $0xe0] ss:$16 sps:$4 sm:$0xff]  }
  0xf3   : > { %v406_v30 = vmul.f32 %v2739_v23, %v2739_v23 }
  0xf4   : > { %388 = vadd.xlane.f32.xlu0 %v387_v27  ;;  %v412_v29 = vadd.f32 %v405_v28, %v404_v25  ;;  %v407_v31 = vmul.f32 %v2743_v26, %v2743_v26  ;;  %v390_v33 = vadd.f32 %v2743_v26, %v2739_v23  ;;  %v2356_v25 = vld [vmem:[%s3564_s3 + $0x104] ss:$16 sps:$4 sm:$0xff]   ;;  %v2360_v27 = vld [vmem:[%s3564_s3 + $0x10c] ss:$16 sps:$4 sm:$0xff]   ;;  %v2358_v28 = vld [vmem:[%s3564_s3 + $0x108] ss:$16 sps:$4 sm:$0xff]  }
  0xf6   : > { %v374_v32 = vpop.f32.mrb[4].mxu0  ;;  %413 = vadd.xlane.f32.xlu1 %v412_v29  ;;  %v415_v38 = vadd.f32 %v407_v31, %v406_v30  ;;  %v2361_v29 = vld [vmem:[%s3564_s3 + $0x100] ss:$16 sps:$4 sm:$0xff]   ;;  %v2362_v30 = vld [vmem:[%s3564_s3 + $0x124] ss:$16 sps:$4 sm:$0xff]  }
  0xf7   : > { %v2755_v34 = vadd.f32 %v374_v32, %v296_v16  ;;  %v376_v35 = vpop.f32.mrb[5].mxu0  ;;  %v2366_v31 = vld [vmem:[%s3564_s3 + $0x12c] ss:$16 sps:$4 sm:$0xff]   ;;  %v2364_v32 = vld [vmem:[%s3564_s3 + $0x128] ss:$16 sps:$4 sm:$0xff]  }
  0xf8   : > { %v2757_v36 = vadd.f32 %v376_v35, %v300_v17  ;;  %v378_v37 = vpop.f32.mrb[6].mxu0  ;;  %391 = vadd.xlane.f32.xlu0 %v390_v33  ;;  %v2367_v33 = vld [vmem:[%s3564_s3 + $0x120] ss:$16 sps:$4 sm:$0xff]   ;;  %v2368_v35 = vld [vmem:[%s3564_s3 + $0x144] ss:$16 sps:$4 sm:$0xff]  }
  0xf9   : > { %v2759_v39 = vadd.f32 %v378_v37, %v296_v16  ;;  %v380_v40 = vpop.f32.mrb[7].mxu0  ;;  %v408_v43 = vmul.f32 %v2755_v34, %v2755_v34  ;;  %v2346_v16 = vld [vmem:[%s3564_s3 + $0xc8] ss:$16 sps:$4 sm:$0xff]   ;;  %v2372_v37 = vld [vmem:[%s3564_s3 + $0x14c] ss:$16 sps:$4 sm:$0xff]  }
  0xfa   : > { %v2761_v41 = vadd.f32 %v380_v40, %v300_v17  ;;  %416 = vadd.xlane.f32.xlu1 %v415_v38  ;;  %v393_v42 = vadd.f32 %v2757_v36, %v2755_v34  ;;  %v409_v44 = vmul.f32 %v2757_v36, %v2757_v36  ;;  %v2349_v17 = vld [vmem:[%s3564_s3 + $0xc0] ss:$16 sps:$4 sm:$0xff]   ;;  %1058 = vmatpush1.bf16.msra.mxu0 %v2346_v16  ;;  %v2370_v38 = vld [vmem:[%s3564_s3 + $0x148] ss:$16 sps:$4 sm:$0xff]  }
  0xfb   : > { %v410_v46 = vmul.f32 %v2759_v39, %v2759_v39  ;;  %1005 = vmatpush1.bf16.msra.mxu1 %v2349_v17  ;;  %1059 = vmatprep.subr.bf16.mxu0 %v2354_v20  ;;  %v2373_v40 = vld [vmem:[%s3564_s3 + $0x140] ss:$16 sps:$4 sm:$0xff]  }
  0xfc   : > { %394 = vadd.xlane.f32.xlu0 %v393_v42  ;;  %v396_v45 = vadd.f32 %v2761_v41, %v2759_v39  ;;  %v411_v47 = vmul.f32 %v2761_v41, %v2761_v41  ;;  %v418_v48 = vadd.f32 %v409_v44, %v408_v43  ;;  %1006 = vmatprep.subr.bf16.mxu1 %v2350_v18  ;;  %v2374_v42 = vld [vmem:[%s3564_s3 + $0x164] ss:$16 sps:$4 sm:$0xff]   ;;  %v2378_v43 = vld [vmem:[%s3564_s3 + $0x16c] ss:$16 sps:$4 sm:$0xff]   ;;  %v2376_v44 = vld [vmem:[%s3564_s3 + $0x168] ss:$16 sps:$4 sm:$0xff]  }
  0xfe   : > { %397 = vadd.xlane.f32.xlu1 %v396_v45  ;;  %v421_v49 = vadd.f32 %v411_v47, %v410_v46  ;;  %1060 = vmatpush1.bf16.msra.mxu0 %v2352_v22  ;;  %v2379_v45 = vld [vmem:[%s3564_s3 + $0x160] ss:$16 sps:$4 sm:$0xff]   ;;  %v2380_v46 = vld [vmem:[%s3564_s3 + $0x184] ss:$16 sps:$4 sm:$0xff]   ;;  %v2384_v47 = vld [vmem:[%s3564_s3 + $0x18c] ss:$16 sps:$4 sm:$0xff]  }
  0xff   : > { %1007 = vmatpush1.bf16.msra.mxu1 %v2355_v24  ;;  %1061 = vmatprep.subr.bf16.mxu0 %v2360_v27 }
 0x100   : > { %419 = vadd.xlane.f32.xlu0 %v418_v48  ;;  %1008 = vmatprep.subr.bf16.mxu1 %v2356_v25  ;;  %v2382_v48 = vld [vmem:[%s3564_s3 + $0x188] ss:$16 sps:$4 sm:$0xff]  }
 0x102   : > { %422 = vadd.xlane.f32.xlu1 %v421_v49  ;;  %1062 = vmatpush1.bf16.msra.mxu0 %v2358_v28  ;;  %v2385_v49 = vld [vmem:[%s3564_s3 + $0x180] ss:$16 sps:$4 sm:$0xff]  }
 0x103   : > { %1009 = vmatpush1.bf16.msra.mxu1 %v2361_v29  ;;  %1063 = vmatprep.subr.bf16.mxu0 %v2366_v31 }
 0x104   : > { %1010 = vmatprep.subr.bf16.mxu1 %v2362_v30 }
 0x106   : > { %1064 = vmatpush1.bf16.msra.mxu0 %v2364_v32 }
 0x107   : > { %1011 = vmatpush1.bf16.msra.mxu1 %v2367_v33  ;;  %1065 = vmatprep.subr.bf16.mxu0 %v2372_v37  ;;  %v2076_v37 = vld [vmem:[%s3563_s2 + $0x1] ss:$8 sm:$0x3] }
 0x108   : > { %1012 = vmatprep.subr.bf16.mxu1 %v2368_v35 }
 0x10a   : > { %1066 = vmatpush1.bf16.msra.mxu0 %v2370_v38 }
 0x10b   : > { %1013 = vmatpush1.bf16.msra.mxu1 %v2373_v40  ;;  %1067 = vmatprep.subr.bf16.mxu0 %v2378_v43 }
 0x10c   : > { %1014 = vmatprep.subr.bf16.mxu1 %v2374_v42  ;;  %v2077_v42 = vld [vmem:[%s3563_s2 + $0x2] ss:$8 sm:$0x3] }
 0x10e   : > { %1068 = vmatpush1.bf16.msra.mxu0 %v2376_v44 }
 0x10f   : > { %1015 = vmatpush1.bf16.msra.mxu1 %v2379_v45  ;;  %1069 = vmatprep.subr.bf16.mxu0 %v2384_v47  ;;  %v468_v45 = vrot.slane %v2076_v37, %v2725_v13 }
 0x110   : > { %1016 = vmatprep.subr.bf16.mxu1 %v2380_v46  ;;  %v472_v46 = vrot.slane %v2076_v37, %v2731_v15 }
 0x112   : > { %1070 = vmatpush1.bf16.msra.mxu0 %v2382_v48 }
 0x113   : > { %1017 = vmatpush1.bf16.msra.mxu1 %v2385_v49  ;;  %1071 = vmatprep.subr.bf16.mxu0 %v2390_v51  ;;  %v491_v51 = vrot.slane %v2077_v42, %v2731_v15 }
 0x114   : > { %1018 = vmatprep.subr.bf16.mxu1 %v2386_v50  ;;  %v487_v50 = vrot.slane %v2077_v42, %v2725_v13 }
 0x116   : > { %1072 = vmatpush1.bf16.msra.mxu0 %v2388_v52 }
 0x117   : > { %1019 = vmatpush1.bf16.msra.mxu1 %v2391_v53  ;;  %1073 = vmatprep.subr.bf16.mxu0 %v2396_v55 }
 0x118   : > { %1020 = vmatprep.subr.bf16.mxu1 %v2392_v54 }
 0x11a   : > { %1074 = vmatpush1.bf16.msra.mxu0 %v2394_v56 }
 0x11b   : > { %1021 = vmatpush1.bf16.msra.mxu1 %v2397_v57  ;;  %1075 = vmatprep.subr.bf16.mxu0 %v2402_v59 }
 0x11c   : > { %1022 = vmatprep.subr.bf16.mxu1 %v2398_v58 }
 0x11e   : > { %1076 = vmatpush1.bf16.msra.mxu0 %v2400_v60 }
 0x11f   : > { %1023 = vmatpush1.bf16.msra.mxu1 %v2403_v61 }
 0x181   : > { %v389_v62 = vpop.xlane.xlu0 %388 }
 0x182   : > { %v400_v63 = vmul.f32 0.00390625, %v389_v62 }
 0x183   : > { %v414_v0 = vpop.xlane.xlu1 %413 }
 0x184   : > { %v424_v1 = vmul.f32 0.00390625, %v414_v0  ;;  %v428_v3 = vmul.f32 %v400_v63, %v400_v63  ;;  %v440_v43 = vsub.f32 %v2735_v19, %v400_v63  ;;  %v441_v44 = vsub.f32 %v2737_v21, %v400_v63 }
 0x185   : > { %v392_v4 = vpop.xlane.xlu0 %391 }
 0x186   : > { %v432_v5 = vsub.f32 %v424_v1, %v428_v3  ;;  %v401_v6 = vmul.f32 0.00390625, %v392_v4 }
 0x187   : > { %v417_v7 = vpop.xlane.xlu1 %416 }
 0x188   : > { %v436_v8 = vmax.f32 %v432_v5, 0.0  ;;  %v425_v9 = vmul.f32 0.00390625, %v417_v7  ;;  %v429_v10 = vmul.f32 %v401_v6, %v401_v6  ;;  %v442_v19 = vsub.f32 %v2739_v23, %v401_v6 }
 0x189   : > { %v395_v11 = vpop.xlane.xlu0 %394  ;;  %v443_v21 = vsub.f32 %v2743_v26, %v401_v6 }
 0x18a   : > { %v448_v14 = vadd.f32 1e-05, %v436_v8  ;;  %v402_v16 = vmul.f32 0.00390625, %v395_v11  ;;  %v433_v17 = vsub.f32 %v425_v9, %v429_v10 }
 0x18b   : > { %v398_v18 = vpop.xlane.xlu1 %397 }
 0x18c   : > { %2460 = vrsqrt.f32 %v448_v14  ;;  %v403_v20 = vmul.f32 0.00390625, %v398_v18  ;;  %v437_v22 = vmax.f32 %v433_v17, 0.0  ;;  %v430_v25 = vmul.f32 %v402_v16, %v402_v16 }
 0x18d   : > { %v420_v24 = vpop.xlane.xlu0 %419  ;;  %v444_v0 = vsub.f32 %v2755_v34, %v402_v16  ;;  %v445_v1 = vsub.f32 %v2757_v36, %v402_v16 }
 0x18e   : > { %v426_v27 = vmul.f32 0.00390625, %v420_v24  ;;  %v449_v28 = vadd.f32 1e-05, %v437_v22  ;;  %v431_v31 = vmul.f32 %v403_v20, %v403_v20  ;;  %v446_v4 = vsub.f32 %v2759_v39, %v403_v20 }
 0x18f   : > { %v423_v29 = vpop.xlane.xlu1 %422  ;;  %v447_v7 = vsub.f32 %v2761_v41, %v403_v20 }
 0x190   : > { %v434_v30 = vsub.f32 %v426_v27, %v430_v25  ;;  %v427_v32 = vmul.f32 0.00390625, %v423_v29  ;;  %2462 = vrsqrt.f32 %v449_v28 }
 0x192   : > { %v438_v33 = vmax.f32 %v434_v30, 0.0  ;;  %v435_v35 = vsub.f32 %v427_v32, %v431_v31 }
 0x194   : > { %v450_v38 = vadd.f32 1e-05, %v438_v33  ;;  %v439_v40 = vmax.f32 %v435_v35, 0.0 }
 0x196   : > { %v2461_v47 = vpop.eup %2460  ;;  %2464 = vrsqrt.f32 %v450_v38  ;;  %v451_v48 = vadd.f32 1e-05, %v439_v40 }
 0x197   : > { %v457_v49 = vmul.f32 %v2461_v47, %v441_v44  ;;  %v456_v52 = vmul.f32 %v2461_v47, %v440_v43 }
 0x198   : > { %2466 = vrsqrt.f32 %v451_v48 }
 0x199   : > { %v476_v53 = vmul.f32 %v472_v46, %v457_v49  ;;  %v475_v54 = vmul.f32 %v468_v45, %v456_v52 }
 0x19a   : > { %v2463_v55 = vpop.eup %2462 }
 0x19b   : > { %v2981_v56 = vadd.f32 %v491_v51, %v476_v53  ;;  %v2983_v57 = vadd.f32 %v487_v50, %v475_v54  ;;  %v459_v58 = vmul.f32 %v2463_v55, %v443_v21  ;;  %v458_v59 = vmul.f32 %v2463_v55, %v442_v19 }
 0x19d   : > { %v503_v60 = vmin.f32 %v2981_v56, 30.0  ;;  %v502_v61 = vmin.f32 %v2983_v57, 30.0  ;;  %v478_v62 = vmul.f32 %v472_v46, %v459_v58  ;;  %v477_v63 = vmul.f32 %v468_v45, %v458_v59 }
 0x19f   : > { %v512_v23 = vmul.f32 1.442695, %v503_v60  ;;  %v510_v3 = vmul.f32 1.442695, %v502_v61  ;;  %v2990_v5 = vadd.f32 %v491_v51, %v478_v62  ;;  %v2992_v6 = vadd.f32 %v487_v50, %v477_v63 }
 0x1a0   : > { %v2465_v26 = vpop.eup %2464 }
 0x1a1   : > { %2468 = vpow2.f32 %v512_v23  ;;  %v461_v8 = vmul.f32 %v2465_v26, %v445_v1  ;;  %v460_v9 = vmul.f32 %v2465_v26, %v444_v0  ;;  %v505_v11 = vmin.f32 %v2990_v5, 30.0 }
 0x1a2   : > { %v2467_v10 = vpop.eup %2466  ;;  %v504_v34 = vmin.f32 %v2992_v6, 30.0  ;;  %2470 = vpow2.f32 %v510_v3 }
 0x1a3   : > { %v463_v36 = vmul.f32 %v2467_v10, %v447_v7  ;;  %v480_v14 = vmul.f32 %v472_v46, %v461_v8  ;;  %v462_v16 = vmul.f32 %v2467_v10, %v446_v4  ;;  %v479_v17 = vmul.f32 %v468_v45, %v460_v9 }
 0x1a4   : > { %v516_v39 = vmul.f32 1.442695, %v505_v11  ;;  %v514_v18 = vmul.f32 1.442695, %v504_v34 }
 0x1a5   : > { %v482_v22 = vmul.f32 %v472_v46, %v463_v36  ;;  %v2997_v24 = vadd.f32 %v491_v51, %v480_v14  ;;  %v481_v25 = vmul.f32 %v468_v45, %v462_v16  ;;  %v2999_v41 = vadd.f32 %v487_v50, %v479_v17 }
 0x1a6   : > { %2472 = vpow2.f32 %v516_v39 }
 0x1a7   : > { %2474 = vpow2.f32 %v514_v18  ;;  %v3001_v20 = vadd.f32 %v491_v51, %v482_v22  ;;  %v507_v27 = vmin.f32 %v2997_v24, 30.0  ;;  %v3004_v28 = vadd.f32 %v487_v50, %v481_v25 }
 0x1a8   : > { %v506_v29 = vmin.f32 %v2999_v41, 30.0 }
 0x1a9   : > { %v509_v30 = vmin.f32 %v3001_v20, 30.0  ;;  %v520_v31 = vmul.f32 1.442695, %v507_v27  ;;  %v508_v32 = vmin.f32 %v3004_v28, 30.0 }
 0x1aa   : > { %v518_v33 = vmul.f32 1.442695, %v506_v29 }
 0x1ab   : > { %v2469_v35 = vpop.eup %2468  ;;  %2476 = vpow2.f32 %v520_v31  ;;  %v524_v37 = vmul.f32 1.442695, %v509_v30  ;;  %v522_v38 = vmul.f32 1.442695, %v508_v32 }
 0x1ac   : > { %v2471_v40 = vpop.eup %2470  ;;  %v527_v42 = vadd.f32 1.0, %v2469_v35  ;;  %2478 = vpow2.f32 %v518_v33 }
 0x1ad   : > { %v526_v43 = vadd.f32 1.0, %v2471_v40  ;;  %2480 = vpow2.f32 %v524_v37 }
 0x1ae   : > { %v535_v44 = vmul.f32 %v527_v42, %v527_v42  ;;  %2482 = vpow2.f32 %v522_v38 }
 0x1af   : > { %v534_v45 = vmul.f32 %v526_v43, %v526_v43 }
 0x1b0   : > { %v2473_v46 = vpop.eup %2472  ;;  %v543_v47 = vadd.f32 1.0, %v535_v44 }
 0x1b1   : > { %v2475_v48 = vpop.eup %2474  ;;  %v529_v49 = vadd.f32 1.0, %v2473_v46  ;;  %v542_v50 = vadd.f32 1.0, %v534_v45 }
 0x1b2   : > { %2484 = vrcp.f32 %v543_v47  ;;  %v528_v51 = vadd.f32 1.0, %v2475_v48 }
 0x1b3   : > { %v537_v52 = vmul.f32 %v529_v49, %v529_v49  ;;  %2486 = vrcp.f32 %v542_v50 }
 0x1b4   : > { %v536_v53 = vmul.f32 %v528_v51, %v528_v51 }
 0x1b5   : > { %v2477_v54 = vpop.eup %2476  ;;  %v545_v19 = vadd.f32 1.0, %v537_v52  ;;  %v3018_v52 = vsub.s32 2, %v2722_v12 }
 0x1b6   : > { %v2479_v21 = vpop.eup %2478  ;;  %v544_v55 = vadd.f32 1.0, %v536_v53  ;;  %v531_v58 = vadd.f32 1.0, %v2477_v54  ;;  %v650_v53 = vld [vmem:[%s3565_s4] ss:$8 sm:$0xf] }
 0x1b7   : > { %v2481_v59 = vpop.eup %2480  ;;  %2488 = vrcp.f32 %v545_v19  ;;  %v530_v60 = vadd.f32 1.0, %v2479_v21 }
 0x1b8   : > { %v2483_v61 = vpop.eup %2482  ;;  %2490 = vrcp.f32 %v544_v55  ;;  %v533_v62 = vadd.f32 1.0, %v2481_v59  ;;  %v539_v63 = vmul.f32 %v531_v58, %v531_v58 }
 0x1b9   : > { %v532_v0 = vadd.f32 1.0, %v2483_v61  ;;  %v538_v1 = vmul.f32 %v530_v60, %v530_v60 }
 0x1ba   : > { %v541_v23 = vmul.f32 %v533_v62, %v533_v62  ;;  %v547_v3 = vadd.f32 1.0, %v539_v63 }
 0x1bb   : > { %v540_v26 = vmul.f32 %v532_v0, %v532_v0  ;;  %v546_v4 = vadd.f32 1.0, %v538_v1 }
 0x1bc   : > { %v2485_v7 = vpop.eup %2484  ;;  %v549_v8 = vadd.f32 1.0, %v541_v23  ;;  %2492 = vrcp.f32 %v547_v3 }
 0x1bd   : > { %v2487_v9 = vpop.eup %2486  ;;  %v548_v10 = vadd.f32 1.0, %v540_v26  ;;  %2494 = vrcp.f32 %v546_v4  ;;  %v559_v11 = vmul.f32 2.0, %v2485_v7 }
 0x1be   : > { %2496 = vrcp.f32 %v549_v8  ;;  %v558_v34 = vmul.f32 2.0, %v2487_v9 }
 0x1bf   : > { %2498 = vrcp.f32 %v548_v10  ;;  %v567_v17 = vsub.f32 1.0, %v559_v11 }
 0x1c0   : > { %v566_v18 = vsub.f32 1.0, %v558_v34 }
 0x1c1   : > { %v2489_v36 = vpop.eup %2488  ;;  %v575_v29 = vmul.f32 %v567_v17, %v2981_v56 }
 0x1c2   : > { %v2491_v14 = vpop.eup %2490  ;;  %v561_v16 = vmul.f32 2.0, %v2489_v36  ;;  %v574_v32 = vmul.f32 %v566_v18, %v2983_v57 }
 0x1c3   : > { %v560_v39 = vmul.f32 2.0, %v2491_v14 }
 0x1c4   : > { %v569_v22 = vsub.f32 1.0, %v561_v16 }
 0x1c5   : > { %v568_v25 = vsub.f32 1.0, %v560_v39 }
 0x1c6   : > { %v2493_v27 = vpop.eup %2492  ;;  %v577_v30 = vmul.f32 %v569_v22, %v2990_v5 }
 0x1c7   : > { %v2495_v31 = vpop.eup %2494  ;;  %v576_v33 = vmul.f32 %v568_v25, %v2992_v6  ;;  %v563_v35 = vmul.f32 2.0, %v2493_v27 }
 0x1c8   : > { %v2497_v37 = vpop.eup %2496  ;;  %v583_v38 = vpack.c.bf16 %v577_v30, %v575_v29  ;;  %v562_v40 = vmul.f32 2.0, %v2495_v31 }
 0x1c9   : > { %v2499_v42 = vpop.eup %2498  ;;  %v582_v43 = vpack.c.bf16 %v576_v33, %v574_v32  ;;  %v565_v44 = vmul.f32 2.0, %v2497_v37  ;;  %v571_v45 = vsub.f32 1.0, %v563_v35 }
 0x1ca   : > { %1024 = vmatprep.mubr.bf16.mxu1 %v583_v38  ;;  %1077 = vmatprep.mubr.bf16.mxu0 %v583_v38  ;;  %v564_v46 = vmul.f32 2.0, %v2499_v42  ;;  %v570_v47 = vsub.f32 1.0, %v562_v40 }
 0x1cb   : > { %1025 = vmatmul.mubr.bf16.vlgmr.msra.gmra.mrb[0].mxu1 %v582_v43  ;;  %1078 = vmatmul.mubr.bf16.vlgmr.msra.gmra.mrb[8].mxu0 %v582_v43  ;;  %v573_v56 = vsub.f32 1.0, %v565_v44  ;;  %v579_v57 = vmul.f32 %v571_v45, %v2997_v24  ;;  %v655_v24 = vrot.slane %v650_v53, %v2725_v13 }
 0x1cc   : > { %v572_v5 = vsub.f32 1.0, %v564_v46  ;;  %v578_v48 = vmul.f32 %v570_v47, %v2999_v41  ;;  %v3026_v41 = vsub.s32 3, %v2722_v12 }
 0x1cd   : > { %v581_v6 = vmul.f32 %v573_v56, %v3001_v20  ;;  %v663_v20 = vrot.slane %v650_v53, %v3018_v52 }
 0x1ce   : > { %v580_v49 = vmul.f32 %v572_v5, %v3004_v28  ;;  %v659_v28 = vrot.slane %v650_v53, %v2731_v15  ;;  %v667_v59 = vrot.slane %v650_v53, %v3026_v41 }
 0x1cf   : > { %v585_v50 = vpack.c.bf16 %v581_v6, %v579_v57 }
 0x1d0   : > { %v584_v51 = vpack.c.bf16 %v580_v49, %v578_v48 }
 0x1d1   : > { %1034 = vmatprep.mubr.bf16.mxu1 %v585_v50  ;;  %1087 = vmatprep.mubr.bf16.mxu0 %v585_v50 }
 0x1d3   : > { %1035 = vmatmul.mubr.bf16.gmra.mrb[4].mxu1 %v584_v51  ;;  %1088 = vmatmul.mubr.bf16.gmra.mrb[12].mxu0 %v584_v51 }
 0x29e   : > { %v1026_v54 = vpop.f32.mrb[0].mxu1  ;;  %v1079_v19 = vpop.f32.mrb[8].mxu0 }
 0x29f   : > { %v3029_v21 = vadd.f32 %v1026_v54, %v655_v24  ;;  %v3031_v55 = vadd.f32 %v1079_v19, %v663_v20  ;;  %v1028_v58 = vpop.f32.mrb[1].mxu1  ;;  %v1081_v60 = vpop.f32.mrb[9].mxu0 }
 0x2a0   : > { %v3034_v61 = vadd.f32 %v1028_v58, %v659_v28  ;;  %v1030_v62 = vpop.f32.mrb[2].mxu1  ;;  %v1083_v63 = vpop.f32.mrb[10].mxu0  ;;  %v3048_v8 = vadd.f32 %v1081_v60, %v667_v59 }
 0x2a1   : > { %v1127_v12 = vmul.f32 %v3029_v21, %v3029_v21  ;;  %v3038_v0 = vadd.f32 %v1030_v62, %v655_v24  ;;  %v1032_v1 = vpop.f32.mrb[3].mxu1  ;;  %v1085_v23 = vpop.f32.mrb[11].mxu0  ;;  %v1129_v7 = vmul.f32 %v3031_v55, %v3031_v55  ;;  %v3052_v10 = vadd.f32 %v1083_v63, %v663_v20 }
 0x2a2   : > { %v1102_v3 = vadd.f32 %v3034_v61, %v3029_v21  ;;  %v1128_v26 = vmul.f32 %v3034_v61, %v3034_v61  ;;  %v3044_v4 = vadd.f32 %v1032_v1, %v659_v28  ;;  %v3059_v16 = vadd.f32 %v1085_v23, %v667_v59 }
 0x2a3   : > { %v1131_v9 = vmul.f32 %v3038_v0, %v3038_v0  ;;  %v1133_v33 = vmul.f32 %v3052_v10, %v3052_v10  ;;  %v1130_v42 = vmul.f32 %v3048_v8, %v3048_v8 }
 0x2a4   : > { %v1107_v11 = vadd.f32 %v3044_v4, %v3038_v0  ;;  %v1132_v34 = vmul.f32 %v3044_v4, %v3044_v4  ;;  %v1103_v36 = vadd.f32 %v1102_v3, %v3031_v55  ;;  %v1143_v14 = vadd.f32 %v1128_v26, %v1127_v12 }
 0x2a5   : > { %v1134_v56 = vmul.f32 %v3059_v16, %v3059_v16 }
 0x2a6   : > { %v1036_v17 = vpop.f32.mrb[4].mxu1  ;;  %v1089_v39 = vpop.f32.mrb[12].mxu0  ;;  %v1104_v18 = vadd.f32 %v1103_v36, %v3048_v8  ;;  %v1108_v22 = vadd.f32 %v1107_v11, %v3052_v10  ;;  %v1144_v25 = vadd.f32 %v1143_v14, %v1129_v7  ;;  %v1148_v32 = vadd.f32 %v1132_v34, %v1131_v9  ;;  %v2404_v11 = vld [vmem:[%s3566_s5 + $0x40] sm:$0xff]  }
 0x2a7   : > { %v3063_v27 = vadd.f32 %v1036_v17, %v655_v24  ;;  %v3065_v29 = vadd.f32 %v1089_v39, %v663_v20  ;;  %v1038_v30 = vpop.f32.mrb[5].mxu1  ;;  %v1091_v31 = vpop.f32.mrb[13].mxu0  ;;  %v2405_v34 = vld [vmem:[%s3566_s5 + $0xc0] sm:$0xff]   ;;  %v2408_v17 = vld [vmem:[%s3566_s5 + $0x48] sm:$0xff]   ;;  %2204 = vmatprep.subr.bf16.mxu1 %v2404_v11 }
 0x2a8   : > { %v3069_v35 = vadd.f32 %v1038_v30, %v659_v28  ;;  %1105 = vadd.xlane.f32.xlu0 %v1104_v18  ;;  %v1040_v37 = vpop.f32.mrb[6].mxu1  ;;  %v1093_v38 = vpop.f32.mrb[14].mxu0  ;;  %v1109_v40 = vadd.f32 %v1108_v22, %v3059_v16  ;;  %v3076_v44 = vadd.f32 %v1091_v31, %v667_v59  ;;  %v1145_v48 = vadd.f32 %v1144_v25, %v1130_v42  ;;  %v2406_v36 = vld [vmem:[%s3566_s5] sm:$0xff]   ;;  %v2409_v39 = vld [vmem:[%s3566_s5 + $0xc8] sm:$0xff]   ;;  %v2412_v25 = vld [vmem:[%s3566_s5 + $0x50] sm:$0xff]  }
 0x2a9   : > { %v1135_v43 = vmul.f32 %v3063_v27, %v3063_v27  ;;  %v3078_v45 = vadd.f32 %v1040_v37, %v655_v24  ;;  %v1042_v46 = vpop.f32.mrb[7].mxu1  ;;  %v1095_v47 = vpop.f32.mrb[15].mxu0  ;;  %v1137_v49 = vmul.f32 %v3065_v29, %v3065_v29  ;;  %v3092_v51 = vadd.f32 %v1093_v38, %v663_v20  ;;  %v2407_v14 = vld [vmem:[%s3566_s5 + $0x80] sm:$0xff]   ;;  %2232 = vmatprep.subr.bf16.mxu0 %v2405_v34  ;;  %v2410_v18 = vld [vmem:[%s3566_s5 + $0x8] sm:$0xff]   ;;  %v2413_v30 = vld [vmem:[%s3566_s5 + $0xd0] sm:$0xff]  }
 0x2aa   : > { %v1112_v5 = vadd.f32 %v3069_v35, %v3063_v27  ;;  %v1136_v57 = vmul.f32 %v3069_v35, %v3069_v35  ;;  %v3086_v6 = vadd.f32 %v1042_v46, %v659_v28  ;;  %1110 = vadd.xlane.f32.xlu1 %v1109_v40  ;;  %v1149_v53 = vadd.f32 %v1148_v32, %v1133_v33  ;;  %v2411_v22 = vld [vmem:[%s3566_s5 + $0x88] sm:$0xff]   ;;  %v2414_v31 = vld [vmem:[%s3566_s5 + $0x10] sm:$0xff]  }
 0x2ab   : > { %v1139_v50 = vmul.f32 %v3078_v45, %v3078_v45  ;;  %v3099_v58 = vadd.f32 %v1095_v47, %v667_v59  ;;  %v1141_v1 = vmul.f32 %v3092_v51, %v3092_v51  ;;  %v1138_v3 = vmul.f32 %v3076_v44, %v3076_v44  ;;  %2205 = vmatpush3.bf16.msra.mxu1 %v2406_v36  ;;  %v2415_v32 = vld [vmem:[%s3566_s5 + $0x90] sm:$0xff]  }
 0x2ac   : > { %v1117_v24 = vadd.f32 %v3086_v6, %v3078_v45  ;;  %v1140_v54 = vmul.f32 %v3086_v6, %v3086_v6  ;;  %1146 = vadd.xlane.f32.xlu0 %v1145_v48  ;;  %v1113_v28 = vadd.f32 %v1112_v5, %v3065_v29  ;;  %v1153_v19 = vadd.f32 %v1136_v57, %v1135_v43 }
 0x2ad   : > { %v1150_v60 = vadd.f32 %v1149_v53, %v1134_v56  ;;  %v1142_v7 = vmul.f32 %v3099_v58, %v3099_v58  ;;  %2233 = vmatpush3.bf16.msra.mxu0 %v2407_v14  ;;  %2206 = vmatprep.subr.bf16.mxu1 %v2408_v17 }
 0x2ae   : > { %v1114_v62 = vadd.f32 %v1113_v28, %v3076_v44  ;;  %v1118_v63 = vadd.f32 %v1117_v24, %v3092_v51  ;;  %v1154_v20 = vadd.f32 %v1153_v19, %v1137_v49  ;;  %v1158_v12 = vadd.f32 %v1140_v54, %v1139_v50  ;;  %2234 = vmatprep.subr.bf16.mxu0 %v2409_v39 }
 0x2af   : > { %1151 = vadd.xlane.f32.xlu1 %v1150_v60  ;;  %2207 = vmatpush3.bf16.msra.mxu1 %v2410_v18 }
 0x2b0   : > { %1115 = vadd.xlane.f32.xlu0 %v1114_v62  ;;  %v1119_v23 = vadd.f32 %v1118_v63, %v3099_v58  ;;  %v1159_v26 = vadd.f32 %v1158_v12, %v1141_v1  ;;  %v1155_v59 = vadd.f32 %v1154_v20, %v1138_v3  ;;  %2208 = vmatprep.subr.bf16.mxu1 %v2412_v25 }
 0x2b1   : > { %2235 = vmatpush3.bf16.msra.mxu0 %v2411_v22 }
 0x2b2   : > { %v1160_v9 = vadd.f32 %v1159_v26, %v1142_v7  ;;  %2236 = vmatprep.subr.bf16.mxu0 %v2413_v30  ;;  %v2142_v26 = vld [vmem:[%s3565_s4 + $0x1] ss:$8 sm:$0xf]  ;;  %v2143_v7 = vld [vmem:[%s3565_s4 + $0x2] ss:$8 sm:$0xf] }
 0x2b3   : > { %1120 = vadd.xlane.f32.xlu1 %v1119_v23  ;;  %2209 = vmatpush3.bf16.msra.mxu1 %v2414_v31  ;;  %v3165_v34 = vrot.slane %v2142_v26, %v2725_v13  ;;  %v3168_v36 = vrot.slane %v2142_v26, %v2731_v15  ;;  %v3171_v17 = vrot.slane %v2142_v26, %v3018_v52 }
 0x2b4   : > { %1156 = vadd.xlane.f32.xlu0 %v1155_v59  ;;  %v3174_v39 = vrot.slane %v2142_v26, %v3026_v41  ;;  %v3177_v18 = vrot.slane %v2143_v7, %v2725_v13  ;;  %v3180_v22 = vrot.slane %v2143_v7, %v2731_v15  ;;  %v3183_v25 = vrot.slane %v2143_v7, %v3018_v52 }
 0x2b5   : > { %2237 = vmatpush3.bf16.msra.mxu0 %v2415_v32  ;;  %v3186_v30 = vrot.slane %v2143_v7, %v3026_v41 }
 0x2b7   : > { %1161 = vadd.xlane.f32.xlu1 %v1160_v9 }
 0x335   : > { %v1106_v33 = vpop.xlane.xlu0 %1105 }
 0x336   : > { %v1123_v37 = vmul.f32 0.001953125, %v1106_v33 }
 0x337   : > { %v1111_v38 = vpop.xlane.xlu1 %1110 }
 0x338   : > { %v3146_v40 = vmul.f32 0.001953125, %v1111_v38  ;;  %v1167_v43 = vmul.f32 %v1123_v37, %v1123_v37  ;;  %v1179_v31 = vsub.f32 %v3029_v21, %v1123_v37  ;;  %v1180_v32 = vsub.f32 %v3034_v61, %v1123_v37 }
 0x339   : > { %v1147_v42 = vpop.xlane.xlu0 %1146  ;;  %v1181_v38 = vsub.f32 %v3031_v55, %v1123_v37  ;;  %v1182_v52 = vsub.f32 %v3048_v8, %v1123_v37 }
 0x33a   : > { %v1163_v46 = vmul.f32 0.001953125, %v1147_v42  ;;  %v1168_v5 = vmul.f32 %v3146_v40, %v3146_v40  ;;  %v1183_v13 = vsub.f32 %v3038_v0, %v3146_v40  ;;  %v1184_v15 = vsub.f32 %v3044_v4, %v3146_v40 }
 0x33b   : > { %v1185_v41 = vsub.f32 %v3052_v10, %v3146_v40  ;;  %v1186_v0 = vsub.f32 %v3059_v16, %v3146_v40 }
 0x33c   : > { %v1171_v47 = vsub.f32 %v1163_v46, %v1167_v43  ;;  %v1152_v56 = vpop.xlane.xlu1 %1151 }
 0x33d   : > { %v1164_v57 = vmul.f32 0.001953125, %v1152_v56  ;;  %v1116_v48 = vpop.xlane.xlu0 %1115 }
 0x33e   : > { %v1175_v49 = vmax.f32 %v1171_v47, 0.0  ;;  %v3150_v50 = vmul.f32 0.001953125, %v1116_v48 }
 0x33f   : > { %v1172_v53 = vsub.f32 %v1164_v57, %v1168_v5 }
 0x340   : > { %v1195_v24 = vadd.f32 1e-05, %v1175_v49  ;;  %v1121_v54 = vpop.xlane.xlu1 %1120  ;;  %v1169_v62 = vmul.f32 %v3150_v50, %v3150_v50  ;;  %v1187_v61 = vsub.f32 %v3063_v27, %v3150_v50  ;;  %v1188_v55 = vsub.f32 %v3069_v35, %v3150_v50 }
 0x341   : > { %v1176_v28 = vmax.f32 %v1172_v53, 0.0  ;;  %v3152_v19 = vmul.f32 0.001953125, %v1121_v54  ;;  %v1157_v60 = vpop.xlane.xlu0 %1156  ;;  %v1189_v56 = vsub.f32 %v3065_v29, %v3150_v50  ;;  %v1190_v35 = vsub.f32 %v3076_v44, %v3150_v50 }
 0x342   : > { %2500 = vrsqrt.f32 %v1195_v24  ;;  %v1165_v63 = vmul.f32 0.001953125, %v1157_v60 }
 0x343   : > { %v1196_v20 = vadd.f32 1e-05, %v1176_v28  ;;  %v1170_v23 = vmul.f32 %v3152_v19, %v3152_v19  ;;  %v1191_v53 = vsub.f32 %v3078_v45, %v3152_v19  ;;  %v1192_v44 = vsub.f32 %v3086_v6, %v3152_v19 }
 0x344   : > { %v1173_v12 = vsub.f32 %v1165_v63, %v1169_v62  ;;  %v1162_v1 = vpop.xlane.xlu1 %1161  ;;  %v1194_v6 = vsub.f32 %v3099_v58, %v3152_v19 }
 0x345   : > { %2502 = vrsqrt.f32 %v1196_v20  ;;  %v1166_v3 = vmul.f32 0.001953125, %v1162_v1  ;;  %v1193_v20 = vsub.f32 %v3092_v51, %v3152_v19 }
 0x346   : > { %v1177_v59 = vmax.f32 %v1173_v12, 0.0 }
 0x347   : > { %v1174_v9 = vsub.f32 %v1166_v3, %v1170_v23 }
 0x348   : > { %v1197_v11 = vadd.f32 1e-05, %v1177_v59 }
 0x349   : > { %v1178_v14 = vmax.f32 %v1174_v9, 0.0 }
 0x34a   : > { %2504 = vrsqrt.f32 %v1197_v11 }
 0x34b   : > { %v1198_v33 = vadd.f32 1e-05, %v1178_v14 }
 0x34c   : > { %v2501_v42 = vpop.eup %2500 }
 0x34d   : > { %2506 = vrsqrt.f32 %v1198_v33  ;;  %v1203_v43 = vmul.f32 %v2501_v42, %v1179_v31  ;;  %v1204_v21 = vmul.f32 %v2501_v42, %v1180_v32  ;;  %v1205_v46 = vmul.f32 %v2501_v42, %v1181_v38 }
 0x34e   : > { %v1206_v47 = vmul.f32 %v2501_v42, %v1182_v52 }
 0x34f   : > { %v2503_v4 = vpop.eup %2502  ;;  %v1240_v8 = vmul.f32 %v3165_v34, %v1203_v43  ;;  %v1241_v37 = vmul.f32 %v3168_v36, %v1204_v21  ;;  %v1242_v10 = vmul.f32 %v3171_v17, %v1205_v46 }
 0x350   : > { %v1207_v5 = vmul.f32 %v2503_v4, %v1183_v13  ;;  %v1208_v57 = vmul.f32 %v2503_v4, %v1184_v15  ;;  %v1209_v27 = vmul.f32 %v2503_v4, %v1185_v41  ;;  %v1243_v48 = vmul.f32 %v3174_v39, %v1206_v47 }
 0x351   : > { %v3213_v16 = vadd.f32 %v3177_v18, %v1240_v8  ;;  %v3216_v40 = vadd.f32 %v3180_v22, %v1241_v37  ;;  %v1210_v49 = vmul.f32 %v2503_v4, %v1186_v0  ;;  %v3226_v50 = vadd.f32 %v3183_v25, %v1242_v10 }
 0x352   : > { %v1244_v29 = vmul.f32 %v3165_v34, %v1207_v5  ;;  %v1245_v24 = vmul.f32 %v3168_v36, %v1208_v57  ;;  %v1246_v54 = vmul.f32 %v3171_v17, %v1209_v27  ;;  %v3242_v12 = vadd.f32 %v3186_v30, %v1243_v48  ;;  %v2418_v5 = vld [vmem:[%s3566_s5 + $0x18] sm:$0xff]   ;;  %v2420_v57 = vld [vmem:[%s3566_s5 + $0x60] sm:$0xff]  }
 0x353   : > { %v1293_v28 = vmax.f32 %v3213_v16, %v3216_v40  ;;  %v1247_v60 = vmul.f32 %v3174_v39, %v1210_v49  ;;  %v2421_v27 = vld [vmem:[%s3566_s5 + $0xe0] sm:$0xff]   ;;  %v2424_v49 = vld [vmem:[%s3566_s5 + $0x68] sm:$0xff]  }
 0x354   : > { %v2505_v62 = vpop.eup %2504  ;;  %v3232_v45 = vadd.f32 %v3177_v18, %v1244_v29  ;;  %v3235_v63 = vadd.f32 %v3180_v22, %v1245_v24  ;;  %v3246_v26 = vadd.f32 %v3183_v25, %v1246_v54  ;;  %v2423_v48 = vld [vmem:[%s3566_s5 + $0xa0] sm:$0xff]   ;;  %v2426_v29 = vld [vmem:[%s3566_s5 + $0x28] sm:$0xff]   ;;  %v2428_v54 = vld [vmem:[%s3566_s5 + $0x70] sm:$0xff]  }
 0x355   : > { %v1294_v1 = vmax.f32 %v1293_v28, %v3226_v50  ;;  %v1211_v23 = vmul.f32 %v2505_v62, %v1187_v61  ;;  %v1212_v3 = vmul.f32 %v2505_v62, %v1188_v55  ;;  %v1213_v7 = vmul.f32 %v2505_v62, %v1189_v56  ;;  %v2427_v24 = vld [vmem:[%s3566_s5 + $0xa8] sm:$0xff]   ;;  %v2430_v28 = vld [vmem:[%s3566_s5 + $0x30] sm:$0xff]  }
 0x356   : > { %v1298_v59 = vmax.f32 %v3232_v45, %v3235_v63  ;;  %v1214_v9 = vmul.f32 %v2505_v62, %v1190_v35  ;;  %v3252_v58 = vadd.f32 %v3186_v30, %v1247_v60  ;;  %v2422_v35 = vld [vmem:[%s3566_s5 + $0x20] sm:$0xff]   ;;  %v2431_v60 = vld [vmem:[%s3566_s5 + $0xb0] sm:$0xff]   ;;  %v2432_v62 = vld [vmem:[%s3566_s5 + $0x78] sm:$0xff]  }
 0x357   : > { %v2507_v11 = vpop.eup %2506  ;;  %v1295_v51 = vmax.f32 %v1294_v1, %v3242_v12  ;;  %v1248_v19 = vmul.f32 %v3165_v34, %v1211_v23  ;;  %v1249_v14 = vmul.f32 %v3168_v36, %v1212_v3  ;;  %v1250_v32 = vmul.f32 %v3171_v17, %v1213_v7  ;;  %v2435_v1 = vld [vmem:[%s3566_s5 + $0xb8] sm:$0xff]  }
 0x358   : > { %v1299_v31 = vmax.f32 %v1298_v59, %v3246_v26  ;;  %v1251_v33 = vmul.f32 %v3174_v39, %v1214_v9  ;;  %v1215_v38 = vmul.f32 %v2507_v11, %v1191_v53  ;;  %v1216_v15 = vmul.f32 %v2507_v11, %v1192_v44  ;;  %v2425_v53 = vld [vmem:[%s3566_s5 + $0xe8] sm:$0xff]   ;;  %v2429_v44 = vld [vmem:[%s3566_s5 + $0xf0] sm:$0xff]  }
 0x359   : > { %1296 = vmax.xlane.f32.xlu0 %v1295_v51  ;;  %v3260_v42 = vadd.f32 %v3177_v18, %v1248_v19  ;;  %v3263_v13 = vadd.f32 %v3180_v22, %v1249_v14  ;;  %v1217_v52 = vmul.f32 %v2507_v11, %v1193_v20  ;;  %v3267_v43 = vadd.f32 %v3183_v25, %v1250_v32  ;;  %v2433_v20 = vld [vmem:[%s3566_s5 + $0xf8] sm:$0xff]  }
 0x35a   : > { %v1300_v41 = vmax.f32 %v1299_v31, %v3252_v58  ;;  %v1218_v21 = vmul.f32 %v2507_v11, %v1194_v6  ;;  %v1252_v61 = vmul.f32 %v3165_v34, %v1215_v38  ;;  %v1253_v55 = vmul.f32 %v3168_v36, %v1216_v15  ;;  %v2434_v6 = vld [vmem:[%s3566_s5 + $0x38] sm:$0xff]  }
 0x35b   : > { %v1303_v46 = vmax.f32 %v3260_v42, %v3263_v13  ;;  %v1254_v47 = vmul.f32 %v3171_v17, %v1217_v52  ;;  %v3275_v0 = vadd.f32 %v3186_v30, %v1251_v33 }
 0x35c   : > { %1301 = vmax.xlane.f32.xlu1 %v1300_v41  ;;  %v1255_v8 = vmul.f32 %v3174_v39, %v1218_v21  ;;  %v3280_v37 = vadd.f32 %v3177_v18, %v1252_v61  ;;  %v3283_v10 = vadd.f32 %v3180_v22, %v1253_v55  ;;  %v2416_v22 = vld [vmem:[%s3566_s5 + $0x58] sm:$0xff]  }
 0x35d   : > { %v1304_v4 = vmax.f32 %v1303_v46, %v3267_v43  ;;  %v3287_v36 = vadd.f32 %v3183_v25, %v1254_v47  ;;  %v2417_v25 = vld [vmem:[%s3566_s5 + $0xd8] sm:$0xff]   ;;  %2210 = vmatprep.subr.bf16.mxu1 %v2416_v22 }
 0x35e   : > { %v1308_v17 = vmax.f32 %v3280_v37, %v3283_v10  ;;  %v3292_v56 = vadd.f32 %v3186_v30, %v1255_v8  ;;  %v2419_v30 = vld [vmem:[%s3566_s5 + $0x98] sm:$0xff]   ;;  %2238 = vmatprep.subr.bf16.mxu0 %v2417_v25  ;;  %2211 = vmatpush3.bf16.msra.mxu1 %v2418_v5 }
 0x35f   : > { %v1305_v34 = vmax.f32 %v1304_v4, %v3275_v0  ;;  %2239 = vmatpush3.bf16.msra.mxu0 %v2419_v30  ;;  %2212 = vmatprep.subr.bf16.mxu1 %v2420_v57 }
 0x360   : > { %v1309_v39 = vmax.f32 %v1308_v17, %v3287_v36  ;;  %2240 = vmatprep.subr.bf16.mxu0 %v2421_v27 }
 0x361   : > { %1306 = vmax.xlane.f32.xlu0 %v1305_v34 }
 0x362   : > { %v1310_v18 = vmax.f32 %v1309_v39, %v3292_v56  ;;  %2213 = vmatpush3.bf16.msra.mxu1 %v2422_v35 }
 0x363   : > { %2241 = vmatpush3.bf16.msra.mxu0 %v2423_v48  ;;  %2214 = vmatprep.subr.bf16.mxu1 %v2424_v49 }
 0x364   : > { %1311 = vmax.xlane.f32.xlu1 %v1310_v18  ;;  %2242 = vmatprep.subr.bf16.mxu0 %v2425_v53 }
 0x366   : > { %2215 = vmatpush3.bf16.msra.mxu1 %v2426_v29 }
 0x367   : > { %2243 = vmatpush3.bf16.msra.mxu0 %v2427_v24  ;;  %2216 = vmatprep.subr.bf16.mxu1 %v2428_v54 }
 0x368   : > { %2244 = vmatprep.subr.bf16.mxu0 %v2429_v44 }
 0x36a   : > { %2217 = vmatpush3.bf16.msra.mxu1 %v2430_v28 }
 0x36b   : > { %2245 = vmatpush3.bf16.msra.mxu0 %v2431_v60  ;;  %2218 = vmatprep.subr.bf16.mxu1 %v2432_v62 }
 0x36c   : > { %2246 = vmatprep.subr.bf16.mxu0 %v2433_v20 }
 0x36e   : > { %2219 = vmatpush3.bf16.msra.mxu1 %v2434_v6 }
 0x36f   : > { %2247 = vmatpush3.bf16.msra.mxu0 %v2435_v1 }
 0x3e6   : > { %v1297_v23 = vpop.xlane.xlu0 %1296 }
 0x3e7   : > { %v1313_v3 = vsub.f32 %v3213_v16, %v1297_v23  ;;  %v1314_v59 = vsub.f32 %v3216_v40, %v1297_v23  ;;  %v1315_v7 = vsub.f32 %v3226_v50, %v1297_v23  ;;  %v1316_v9 = vsub.f32 %v3242_v12, %v1297_v23 }
 0x3e9   : > { %v1329_v11 = vmax.f32 %v1313_v3, -80.0  ;;  %v1330_v51 = vmax.f32 %v1314_v59, -80.0  ;;  %v1331_v19 = vmax.f32 %v1315_v7, -80.0  ;;  %v1332_v14 = vmax.f32 %v1316_v9, -80.0  ;;  %v1302_v31 = vpop.xlane.xlu1 %1301 }
 0x3ea   : > { %v1317_v32 = vsub.f32 %v3232_v45, %v1302_v31  ;;  %v1318_v33 = vsub.f32 %v3235_v63, %v1302_v31  ;;  %v1319_v38 = vsub.f32 %v3246_v26, %v1302_v31  ;;  %v1320_v15 = vsub.f32 %v3252_v58, %v1302_v31 }
 0x3eb   : > { %v1345_v16 = vmul.f32 1.442695, %v1329_v11  ;;  %v1347_v52 = vmul.f32 1.442695, %v1330_v51  ;;  %v1349_v40 = vmul.f32 1.442695, %v1331_v19 }
 0x3ec   : > { %v1351_v41 = vmul.f32 1.442695, %v1332_v14  ;;  %v1333_v50 = vmax.f32 %v1317_v32, -80.0  ;;  %v1334_v21 = vmax.f32 %v1318_v33, -80.0  ;;  %v1335_v12 = vmax.f32 %v1319_v38, -80.0 }
 0x3ed   : > { %2508 = vpow2.f32 %v1345_v16  ;;  %v1336_v46 = vmax.f32 %v1320_v15, -80.0  ;;  %v2438_v15 = vld [vmem:[%s3567_s6 + $0x4] ss:$16 sps:$4 sm:$0xff]   ;;  %v2441_v16 = vld [vmem:[%s3567_s6 + $0xc] ss:$16 sps:$4 sm:$0xff]  }
 0x3ee   : > { %2510 = vpow2.f32 %v1347_v52  ;;  %v1353_v61 = vmul.f32 1.442695, %v1333_v50  ;;  %v1355_v55 = vmul.f32 1.442695, %v1334_v21  ;;  %v1307_v47 = vpop.xlane.xlu0 %1306  ;;  %v1357_v45 = vmul.f32 1.442695, %v1335_v12  ;;  %1848 = vmatprep.subr.bf16.mxu1 %v2438_v15  ;;  %1901 = vmatprep.subr.bf16.mxu0 %v2441_v16 }
 0x3ef   : > { %2512 = vpow2.f32 %v1349_v40  ;;  %v1321_v63 = vsub.f32 %v3260_v42, %v1307_v47  ;;  %v1322_v26 = vsub.f32 %v3263_v13, %v1307_v47  ;;  %v1359_v58 = vmul.f32 1.442695, %v1336_v46  ;;  %v2436_v52 = vld [vmem:[%s3567_s6] ss:$16 sps:$4 sm:$0xff]   ;;  %v2439_v40 = vld [vmem:[%s3567_s6 + $0x8] ss:$16 sps:$4 sm:$0xff]  }
 0x3f0   : > { %2514 = vpow2.f32 %v1351_v41  ;;  %v1323_v4 = vsub.f32 %v3267_v43, %v1307_v47  ;;  %v1324_v8 = vsub.f32 %v3275_v0, %v1307_v47  ;;  %v2444_v41 = vld [vmem:[%s3567_s6 + $0x24] ss:$16 sps:$4 sm:$0xff]   ;;  %v2447_v50 = vld [vmem:[%s3567_s6 + $0x2c] ss:$16 sps:$4 sm:$0xff]   ;;  %v2442_v21 = vld [vmem:[%s3567_s6 + $0x20] ss:$16 sps:$4 sm:$0xff]  }
 0x3f1   : > { %2516 = vpow2.f32 %v1353_v61  ;;  %v1337_v34 = vmax.f32 %v1321_v63, -80.0  ;;  %v1338_v17 = vmax.f32 %v1322_v26, -80.0  ;;  %v1312_v22 = vpop.xlane.xlu1 %1311  ;;  %v2445_v12 = vld [vmem:[%s3567_s6 + $0x28] ss:$16 sps:$4 sm:$0xff]   ;;  %v2450_v46 = vld [vmem:[%s3567_s6 + $0x44] ss:$16 sps:$4 sm:$0xff]  }
 0x3f2   : > { %2518 = vpow2.f32 %v1355_v55  ;;  %v1339_v39 = vmax.f32 %v1323_v4, -80.0  ;;  %v1340_v18 = vmax.f32 %v1324_v8, -80.0  ;;  %v1325_v42 = vsub.f32 %v3280_v37, %v1312_v22  ;;  %v2453_v61 = vld [vmem:[%s3567_s6 + $0x4c] ss:$16 sps:$4 sm:$0xff]   ;;  %v2448_v55 = vld [vmem:[%s3567_s6 + $0x40] ss:$16 sps:$4 sm:$0xff]  }
 0x3f3   : > { %2520 = vpow2.f32 %v1357_v45  ;;  %v1361_v25 = vmul.f32 1.442695, %v1337_v34  ;;  %v1363_v5 = vmul.f32 1.442695, %v1338_v17  ;;  %v1326_v57 = vsub.f32 %v3283_v10, %v1312_v22  ;;  %v2451_v47 = vld [vmem:[%s3567_s6 + $0x48] ss:$16 sps:$4 sm:$0xff]  }
 0x3f4   : > { %2522 = vpow2.f32 %v1359_v58  ;;  %v1365_v13 = vmul.f32 1.442695, %v1339_v39  ;;  %v1367_v30 = vmul.f32 1.442695, %v1340_v18  ;;  %v1327_v43 = vsub.f32 %v3287_v36, %v1312_v22  ;;  %v2456_v45 = vld [vmem:[%s3567_s6 + $0x64] ss:$16 sps:$4 sm:$0xff]  }
 0x3f5   : > { %2524 = vpow2.f32 %v1361_v25  ;;  %v1328_v0 = vsub.f32 %v3292_v56, %v1312_v22  ;;  %v1341_v27 = vmax.f32 %v1325_v42, -80.0  ;;  %v1342_v35 = vmax.f32 %v1326_v57, -80.0  ;;  %v2459_v63 = vld [vmem:[%s3567_s6 + $0x6c] ss:$16 sps:$4 sm:$0xff]   ;;  %v2454_v26 = vld [vmem:[%s3567_s6 + $0x60] ss:$16 sps:$4 sm:$0xff]  }
 0x3f6   : > { %2526 = vpow2.f32 %v1363_v5  ;;  %v1343_v49 = vmax.f32 %v1327_v43, -80.0  ;;  %v2457_v58 = vld [vmem:[%s3567_s6 + $0x68] ss:$16 sps:$4 sm:$0xff]  }
 0x3f7   : > { %v3372_v48 = vpop.eup %2508  ;;  %2528 = vpow2.f32 %v1365_v13  ;;  %v1344_v53 = vmax.f32 %v1328_v0, -80.0  ;;  %v1369_v29 = vmul.f32 1.442695, %v1341_v27  ;;  %v1371_v24 = vmul.f32 1.442695, %v1342_v35 }
 0x3f8   : > { %v3374_v37 = vpop.eup %2510  ;;  %2530 = vpow2.f32 %v1367_v30  ;;  %v1373_v10 = vmul.f32 1.442695, %v1343_v49 }
 0x3f9   : > { %v3376_v54 = vpop.eup %2512  ;;  %2532 = vpow2.f32 %v1369_v29  ;;  %v1375_v36 = vmul.f32 1.442695, %v1344_v53 }
 0x3fa   : > { %v3378_v44 = vpop.eup %2514  ;;  %2534 = vpow2.f32 %v1371_v24 }
 0x3fb   : > { %v3380_v56 = vpop.eup %2516  ;;  %2536 = vpow2.f32 %v1373_v10 }
 0x3fc   : > { %v3382_v28 = vpop.eup %2518  ;;  %2538 = vpow2.f32 %v1375_v36  ;;  %v1377_v60 = vpack.c.bf16 %v3380_v56, %v3372_v48 }
 0x3fd   : > { %v3386_v62 = vpop.eup %2520  ;;  %v1378_v20 = vpack.c.bf16 %v3382_v28, %v3374_v37 }
 0x3fe   : > { %v3390_v6 = vpop.eup %2522  ;;  %v1379_v1 = vpack.c.bf16 %v3386_v62, %v3376_v54 }
 0x3ff   : > { %v3394_v23 = vpop.eup %2524  ;;  %1673 = vmatprep.mubr.bf16.mxu1 %v1378_v20  ;;  %v1380_v3 = vpack.c.bf16 %v3390_v6, %v3378_v44 }
 0x400   : > { %v3398_v59 = vpop.eup %2526  ;;  %1674 = vmatmul.mubr.bf16.vlgmr.msra.gmra.mrb[8].mxu1 %v1377_v60 }
 0x401   : > { %v3400_v7 = vpop.eup %2528  ;;  %1722 = vmatprep.mubr.bf16.mxu0 %v1380_v3  ;;  %1849 = vmatpush1.bf16.msra.mxu1 %v2436_v52 }
 0x402   : > { %v3402_v9 = vpop.eup %2530  ;;  %1723 = vmatmul.mubr.bf16.vlgmr.msra.gmra.mrb[16].mxu0 %v1379_v1  ;;  %1850 = vmatprep.subr.bf16.mxu1 %v2444_v41 }
 0x403   : > { %v3404_v11 = vpop.eup %2532  ;;  %1902 = vmatpush1.bf16.msra.mxu0 %v2439_v40 }
 0x404   : > { %v3406_v51 = vpop.eup %2534  ;;  %v1381_v19 = vpack.c.bf16 %v3404_v11, %v3394_v23  ;;  %1903 = vmatprep.subr.bf16.mxu0 %v2447_v50 }
 0x405   : > { %v3410_v14 = vpop.eup %2536  ;;  %v1382_v31 = vpack.c.bf16 %v3406_v51, %v3398_v59  ;;  %1851 = vmatpush1.bf16.msra.mxu1 %v2442_v21 }
 0x406   : > { %v3414_v32 = vpop.eup %2538  ;;  %v1383_v33 = vpack.c.bf16 %v3410_v14, %v3400_v7  ;;  %1852 = vmatprep.subr.bf16.mxu1 %v2450_v46 }
 0x407   : > { %1681 = vmatprep.mubr.bf16.mxu1 %v1382_v31  ;;  %v1384_v38 = vpack.c.bf16 %v3414_v32, %v3402_v9  ;;  %1904 = vmatpush1.bf16.msra.mxu0 %v2445_v12 }
 0x408   : > { %1682 = vmatmul.mubr.bf16.gmra.mrb[12].mxu1 %v1381_v19  ;;  %1905 = vmatprep.subr.bf16.mxu0 %v2453_v61 }
 0x409   : > { %1730 = vmatprep.mubr.bf16.mxu0 %v1384_v38  ;;  %1880 = vmatprep.mubr.bf16.mxu1 %v2612_v2 }
 0x40a   : > { %1731 = vmatmul.mubr.bf16.gmra.mrb[20].mxu0 %v1383_v33  ;;  %1853 = vmatpush1.bf16.msra.mxu1 %v2448_v55 }
 0x40b   : > { %1933 = vmatprep.mubr.bf16.mxu0 %v2612_v2  ;;  %1906 = vmatpush1.bf16.msra.mxu0 %v2451_v47 }
 0x40c   : > { %1854 = vmatprep.subr.bf16.mxu1 %v2456_v45  ;;  %1907 = vmatprep.subr.bf16.mxu0 %v2459_v63 }
 0x40e   : > { %1855 = vmatpush1.bf16.msra.mxu1 %v2454_v26 }
 0x40f   : > { %1908 = vmatpush1.bf16.msra.mxu0 %v2457_v58 }
 0x4d3   : > { %v2220_v4 = vpop.f32.mrb[8].mxu1 }
 0x4d4   : > { %v2221_v8 = vpop.f32.mrb[9].mxu1 }
 0x4d5   : > { %v2248_v34 = vpop.f32.mrb[16].mxu0  ;;  %v2222_v17 = vadd.f32 %v2221_v8, %v2220_v4  ;;  %v2223_v39 = vpop.f32.mrb[10].mxu1 }
 0x4d6   : > { %v2249_v18 = vpop.f32.mrb[17].mxu0  ;;  %v2224_v22 = vpop.f32.mrb[11].mxu1 }
 0x4d7   : > { %v2250_v25 = vadd.f32 %v2249_v18, %v2248_v34  ;;  %v2251_v5 = vpop.f32.mrb[18].mxu0  ;;  %v2225_v42 = vadd.f32 %v2224_v22, %v2223_v39 }
 0x4d8   : > { %v2252_v13 = vpop.f32.mrb[19].mxu0 }
 0x4d9   : > { %v1725_v30 = vadd.f32 %v2250_v25, %v2222_v17  ;;  %v2253_v57 = vadd.f32 %v2252_v13, %v2251_v5 }
 0x4db   : > { %v1728_v43 = vadd.f32 %v2253_v57, %v2225_v42  ;;  %v2226_v0 = vpop.f32.mrb[12].mxu1  ;;  %2540 = vrcp.f32 %v1725_v30 }
 0x4dc   : > { %v2227_v27 = vpop.f32.mrb[13].mxu1 }
 0x4dd   : > { %2542 = vrcp.f32 %v1728_v43  ;;  %v2254_v35 = vpop.f32.mrb[20].mxu0  ;;  %v2228_v49 = vadd.f32 %v2227_v27, %v2226_v0  ;;  %v2229_v53 = vpop.f32.mrb[14].mxu1 }
 0x4de   : > { %v2255_v29 = vpop.f32.mrb[21].mxu0  ;;  %v2230_v24 = vpop.f32.mrb[15].mxu1 }
 0x4df   : > { %v2256_v10 = vadd.f32 %v2255_v29, %v2254_v35  ;;  %v2257_v36 = vpop.f32.mrb[22].mxu0  ;;  %v2231_v60 = vadd.f32 %v2230_v24, %v2229_v53 }
 0x4e0   : > { %v2258_v20 = vpop.f32.mrb[23].mxu0 }
 0x4e1   : > { %v1733_v1 = vadd.f32 %v2256_v10, %v2228_v49  ;;  %v2259_v3 = vadd.f32 %v2258_v20, %v2257_v36 }
 0x4e3   : > { %v1736_v19 = vadd.f32 %v2259_v3, %v2231_v60  ;;  %2544 = vrcp.f32 %v1733_v1 }
 0x4e5   : > { %2546 = vrcp.f32 %v1736_v19  ;;  %v2541_v31 = vpop.eup %2540 }
 0x4e7   : > { %v2543_v33 = vpop.eup %2542 }
 0x4e8   : > { %v1743_v38 = vpack.c.bf16 %v2543_v33, %v2541_v31 }
 0x4ea   : > { %2192 = vmatmul.mubr.msk.bf16.vlgmr.msra.gmra.mrb[16].mxu1 %vm1841_vm1, %v1743_v38  ;;  %2194 = vmatmul.mubr.msk.bf16.vlgmr.msra.gmra.mrb[24].mxu0 %vm1841_vm1, %v1743_v38 }
 0x4eb   : > { %1890 = vmatprep.mubr.bf16.mxu1 %v2612_v2  ;;  %1943 = vmatprep.mubr.bf16.mxu0 %v2612_v2 }
 0x4ed   : > { %v2545_v15 = vpop.eup %2544 }
 0x4ef   : > { %v2547_v16 = vpop.eup %2546 }
 0x4f0   : > { %v1744_v52 = vpack.c.bf16 %v2547_v16, %v2545_v15 }
 0x4f2   : > { %2193 = vmatmul.mubr.msk.bf16.gmra.mrb[20].mxu1 %vm1841_vm1, %v1744_v52  ;;  %2195 = vmatmul.mubr.msk.bf16.gmra.mrb[28].mxu0 %vm1841_vm1, %v1744_v52 }
 0x5bd   : > { %v1882_v40 = vpop.f32.mrb[16].mxu1  ;;  %v1935_v41 = vpop.f32.mrb[24].mxu0 }
 0x5be   : > { %v1954_v50 = vmul.f32 %v3372_v48, %v1882_v40  ;;  %v1956_v21 = vmul.f32 %v3376_v54, %v1935_v41  ;;  %v1884_v12 = vpop.f32.mrb[17].mxu1  ;;  %v1937_v46 = vpop.f32.mrb[25].mxu0 }
 0x5bf   : > { %v1955_v61 = vmul.f32 %v3374_v37, %v1884_v12  ;;  %v1957_v2 = vmul.f32 %v3378_v44, %v1937_v46  ;;  %v1886_v55 = vpop.f32.mrb[18].mxu1  ;;  %v1939_v47 = vpop.f32.mrb[26].mxu0 }
 0x5c0   : > { %1970 = vst [vmem:[%s3479_s9] sm:$0xff] %v1954_v50  ;;  %1972 = vst [vmem:[%s3479_s9 + $0x10] sm:$0xff] %v1956_v21  ;;  %v1958_v48 = vmul.f32 %v3380_v56, %v1886_v55  ;;  %v1960_v37 = vmul.f32 %v3386_v62, %v1939_v47  ;;  %v1888_v54 = vpop.f32.mrb[19].mxu1  ;;  %v1941_v44 = vpop.f32.mrb[27].mxu0 }
 0x5c1   : > { %1971 = vst [vmem:[%s3479_s9 + $0x8] sm:$0xff] %v1955_v61  ;;  %1973 = vst [vmem:[%s3479_s9 + $0x18] sm:$0xff] %v1957_v2  ;;  %v1959_v45 = vmul.f32 %v3382_v28, %v1888_v54  ;;  %v1961_v63 = vmul.f32 %v3390_v6, %v1941_v44 }
 0x5c2   : > { %1974 = vst [vmem:[%s3479_s9 + $0x20] sm:$0xff] %v1958_v48  ;;  %1976 = vst [vmem:[%s3479_s9 + $0x30] sm:$0xff] %v1960_v37 }
 0x5c3   : > { %1975 = vst [vmem:[%s3479_s9 + $0x28] sm:$0xff] %v1959_v45  ;;  %1977 = vst [vmem:[%s3479_s9 + $0x38] sm:$0xff] %v1961_v63 }
 0x5c5   : > { %v1892_v26 = vpop.f32.mrb[20].mxu1  ;;  %v1945_v58 = vpop.f32.mrb[28].mxu0 }
 0x5c6   : > { %v1962_v56 = vmul.f32 %v3394_v23, %v1892_v26  ;;  %v1964_v62 = vmul.f32 %v3400_v7, %v1945_v58  ;;  %v1894_v4 = vpop.f32.mrb[21].mxu1  ;;  %v1947_v28 = vpop.f32.mrb[29].mxu0 }
 0x5c7   : > { %v1963_v6 = vmul.f32 %v3398_v59, %v1894_v4  ;;  %v1965_v8 = vmul.f32 %v3402_v9, %v1947_v28  ;;  %v1896_v34 = vpop.f32.mrb[22].mxu1  ;;  %v1949_v17 = vpop.f32.mrb[30].mxu0 }
 0x5c8   : > { %1978 = vst [vmem:[%s3479_s9 + $0x40] sm:$0xff] %v1962_v56  ;;  %1980 = vst [vmem:[%s3479_s9 + $0x50] sm:$0xff] %v1964_v62  ;;  %v1966_v23 = vmul.f32 %v3404_v11, %v1896_v34  ;;  %v1968_v7 = vmul.f32 %v3410_v14, %v1949_v17  ;;  %v1898_v39 = vpop.f32.mrb[23].mxu1  ;;  %v1951_v18 = vpop.f32.mrb[31].mxu0 }
 0x5c9   : > { %1979 = vst [vmem:[%s3479_s9 + $0x48] sm:$0xff] %v1963_v6  ;;  %1981 = vst [vmem:[%s3479_s9 + $0x58] sm:$0xff] %v1965_v8  ;;  %v1967_v59 = vmul.f32 %v3406_v51, %v1898_v39  ;;  %v1969_v9 = vmul.f32 %v3414_v32, %v1951_v18 }
 0x5ca   : > { %1982 = vst [vmem:[%s3479_s9 + $0x60] sm:$0xff] %v1966_v23  ;;  %1984 = vst [vmem:[%s3479_s9 + $0x70] sm:$0xff] %v1968_v7 }
 0x5cb   : > { %1983 = vst [vmem:[%s3479_s9 + $0x68] sm:$0xff] %v1967_v59  ;;  %1985 = vst [vmem:[%s3479_s9 + $0x78] sm:$0xff] %v1969_v9 }
 0x5cc   : > { %2561 = shalt.err (!%p2558_p3)
}
 0x5cd   : > { %s2562_s22 = scalar_lea.hbm %s3506_s16, 2048  ;;  %s2566_s8 = scalar_lea.hbm %s3568_s7, 16384 }
 0x5ce   : > { %p2563_p4 = scmp.ne.s32.totalorder %s3506_s16, %s2562_s22  ;;  %p2567_p9 = scmp.lt.u32.totalorder %s3506_s16, %s3568_s7 }
 0x5cf   : > { %p2568_p10 = scmp.lt.u32.totalorder %s2566_s8, %s2562_s22  ;;  %p2570_p12 = scmp.lt.u32.totalorder %s2562_s22, %s3506_s16 }
 0x5d0   : > { %p2564_p7 = pnand %p2563_p4, %p2694_p5 }
 0x5d1   : > { %p2569_p11 = por %p2568_p10, %p2567_p9 }
 0x5d2   : > { %p2565_p8 = pneg %p2564_p7 }
 0x5d3   : > { %p2571_p13 = por %p2570_p12, %p2569_p11 }
 0x5d5   : > { %p2572_p0 = pnand %p2571_p13, %p2565_p8 }
 0x5d7   : > { %2575 = shalt.err (!%p2572_p0)
}
 0x5d8   : > { %s2614_s28 = smov 512   ;;  %s2615_s15 = smov 32  }
 0x5d9   : > { %2260 = dma.vmem_to_hbm [thread:$0]  (%p2694_p5), %s3508_s14, 2048, %s3506_s16, %s3520_s17, %s2614_s28, %s2614_s28, %s2615_s15  }
 0x5da PF: > { %p2266_p1 = scmp.ge.s32.totalorder %s2610_s27, 2  ;;  %s2016_s18 = sand.u32 1, %s2598_s24  }
 0x5db   : > { %s2017_s19 = scalar_lea.sflag [#allocation3], %s2016_s18 }
 0x5dc   : > { %p2263_p2 = pnand %p2266_p1, %p2698_p6 }
 0x5de   : > { %2593 = dma.done.wait (!%p2263_p2), %s2017_s19, 2048  }
 0x5df   : > { %2595 = vsyncadd (!%p2263_p2), %s2017_s19, 4294965248  ;;  %p17_p3 = scmp.ge.s32.totalorder %s2681_s30, 10   ;;  %s3571_s24 = smov %s2602_s25 }
 0x5e0   : > { %s3572_s25 = smov %s2606_s26  ;;  %s3573_s26 = smov %s2692_s10 }
 0x5e1   : > { %s3574_s27 = smov %s2681_s30  ;;  %19 = sbr.rel (!%p17_p3) target bundleno = 3 (0x3), region = 87 }
 0x5e8   :  { %2022 = vsyncpa [#allocation3], 1 }
 0x5e9   :  { %2024 = vsyncpa [#allocation3 + $0x1], 1 }

</bundles_post_ra>
